<compile_context>
chip_gen: v7x
topology: tpu7x:2x2x1
jax: 0.10.0
libtpu: 0.0.40
codegen_flags: <defaults>
</compile_context>

<pallas_src>
import jax
import jax.numpy as jnp
from jax import lax
from jax.experimental import pallas as pl
from jax.experimental.pallas import tpu as pltpu
import numpy as np


# ----------------------------------------------------------------------------- #
# Fused Pallas kernel
# ----------------------------------------------------------------------------- #
def _fused_cnn_lstm_kernel(xT_ref, w1bd_ref, b1t_ref, b2t_ref,
                           whh_f_ref, bf_ref, wih_r_ref, br_ref,
                           wc1f_ref, wc1b_ref, bc1_ref, wc2_ref, bc2_ref,
                           w2bd_hbm, wih_f_hbm,
                           out_ref,
                           w2_vmem, wih_vmem, dma_sem):
    """Entire CNNLSTMClassifier forward.

    xT_ref : (B, W, H)  transposed input image [b, w=time, h=mfcc] (no padding; the conv
             'same' h-padding lives in the weight rows, the w-padding is added in-kernel
             as zero sublane rows).
    Feature maps are kept in layout [row=(b, w), col = h*C + c] so that:
      - each conv is ONE matmul against a kh-absorbed block-structured weight,
      - 2x2 max-pool = sublane-pair max (w) + contiguous 128-lane-half max (h),
      - the LSTM time axis (= w) is already the row axis (no permute needed).
    """
    f32 = jnp.float32
    bf16 = jnp.bfloat16
    B, W1, H1 = xT_ref.shape           # 2, 16, 16
    C1, C2 = 16, 32
    Wo1, Ho1 = W1 // 2, H1 // 2        # 8, 8
    Wo2, Ho2 = Wo1 // 2, Ho1 // 2      # 4, 4   (T = Wo2)
    HID = whh_f_ref.shape[0]           # 32
    G = 4 * HID                        # 128
    hc = Ho1 * C1                      # 128
    hc2 = Ho2 * C2                     # 128

    # Kick off the two largest weight DMAs immediately so they overlap conv1 compute;
    # they are waited on only right before their consuming matmuls.
    cp_w2 = pltpu.make_async_copy(w2bd_hbm, w2_vmem, dma_sem.at[0])
    cp_wih = pltpu.make_async_copy(wih_f_hbm, wih_vmem, dma_sem.at[1])
    cp_w2.start()
    cp_wih.start()

    # -------- CNN block 1: Conv2d(1,16,3,p=1) + MaxPool(2,2) + ReLU (hoisted) --------
    xT = xT_ref[...]                                              # (B, W1, H1)
    zw = jnp.zeros((B, 1, H1), f32)
    xpw = jnp.concatenate([zw, xT, zw], axis=1)                   # w zero-pad -> (B, W1+2, H1)
    # Three kw slabs (sublane-window slices, full-width lanes); kh taps live in W1bd rows.
    p1 = jnp.concatenate([xpw[:, kw:kw + W1, :] for kw in range(3)], axis=-1)  # (B, W1, 3*H1)
    p1 = p1.reshape(B * W1, 3 * H1).astype(bf16)
    z1 = jnp.dot(p1, w1bd_ref[...], preferred_element_type=f32)   # (B*W1, 2*Ho1*C1)
    z1 = z1.reshape(B * Wo1, 2, 2 * hc)                           # [(b,wo), pw, (ph,ho,c)]
    m1 = jnp.max(z1, axis=1)                                      # max over pw
    m1 = jnp.maximum(m1[:, :hc], m1[:, hc:])                      # max over ph
    y1 = jnp.maximum(m1 + b1t_ref[...], 0.0)                      # (B*Wo1, 128): [(b,w1), h1*C1+c]
    y1 = y1.reshape(B, Wo1, hc)

    # -------- CNN block 2: Conv2d(16,32,3,p=1) + MaxPool(2,2) + ReLU (hoisted) --------
    zw2 = jnp.zeros((B, 1, hc), f32)
    y1pw = jnp.concatenate([zw2, y1, zw2], axis=1)                # w zero-pad -> (B, Wo1+2, 128)
    # Three lane-aligned 128-wide kw slabs; kh + ci taps live in W2bd rows.
    p2 = jnp.concatenate([y1pw[:, kw:kw + Wo1, :] for kw in range(3)], axis=-1)  # (B, Wo1, 384)
    p2 = p2.reshape(B * Wo1, 3 * hc).astype(bf16)
    cp_w2.wait()                                                  # w2bd now resident in VMEM
    z2 = jnp.dot(p2, w2_vmem[...], preferred_element_type=f32)    # (B*Wo1, 2*Ho2*C2)
    z2 = z2.reshape(B * Wo2, 2, 2 * hc2)
    m2 = jnp.max(z2, axis=1)
    m2 = jnp.maximum(m2[:, :hc2], m2[:, hc2:])
    y2 = jnp.maximum(m2 + b2t_ref[...], 0.0)                      # (B*T, 128): [(b,t), h2*C2+c]

    # -------- bidirectional LSTM, last-time-step output --------
    # Input projections hoisted out of the recurrence.  wih_* rows are pre-permuted so
    # y2's (h2*C2+c) feature order matches torch's rnn_in (c*Ho2+h2) order implicitly.
    cp_wih.wait()                                                 # wih_f now resident in VMEM
    gih_f = jnp.dot(y2.astype(bf16), wih_vmem[...],
                    preferred_element_type=f32) + bf_ref[...]     # (B*T, 4H)
    gih_f = gih_f.reshape(B, Wo2, G)
    x_last = y2.reshape(B, Wo2, hc2)[:, Wo2 - 1, :].astype(bf16)  # (B, 128)
    gih_r = jnp.dot(x_last, wih_r_ref[...],
                    preferred_element_type=f32) + br_ref[...]     # (B, 4H)

    lane = lax.broadcasted_iota(jnp.int32, (B, G), 1)
    g_mask = (lane >= 2 * HID) & (lane < 3 * HID)                 # tanh lanes (g-gate)
    pre_scale = jnp.where(g_mask, 1.0, 0.5)

    def activate(g):
        # sigmoid(x) = 0.5*tanh(0.5x)+0.5 -> one full-width EUP tanh covers all 4 gates.
        t = jnp.tanh(g * pre_scale)
        return jnp.where(g_mask, t, 0.5 * t + 0.5)

    whh_f = whh_f_ref[...]                                        # (H, 4H) bf16

    # t = 0: h_prev = c_prev = 0  ->  skip h@Whh and the f*c term (exact).
    a = activate(gih_f[:, 0, :])
    c = a[:, 0:HID] * a[:, 2 * HID:3 * HID]
    h = a[:, 3 * HID:4 * HID] * jnp.tanh(c)
    # TODO(synk): keep whh_f resident in MXU weight regs via pltpu.matmul_push_rhs /
    #             matmul_acc_lhs / matmul_pop to avoid re-pushing the loop-invariant RHS
    #             on each of the 3 dependent recurrence steps.
    for t in range(1, Wo2):                                       # T is tiny -> static unroll
        g = gih_f[:, t, :] + jnp.dot(h.astype(bf16), whh_f, preferred_element_type=f32)
        a = activate(g)
        c = a[:, HID:2 * HID] * c + a[:, 0:HID] * a[:, 2 * HID:3 * HID]
        h = a[:, 3 * HID:4 * HID] * jnp.tanh(c)

    # Reverse direction at t = T-1 == one cell step from a zero state (no Whh matmul).
    a_r = activate(gih_r)
    c_r = a_r[:, 0:HID] * a_r[:, 2 * HID:3 * HID]
    h_r = a_r[:, 3 * HID:4 * HID] * jnp.tanh(c_r)

    # -------- classifier: Linear(2H,64) -> ReLU -> Dropout -> Linear(64,1) -> Sigmoid --------
    z1c = (jnp.dot(h.astype(bf16), wc1f_ref[...], preferred_element_type=f32)
           + jnp.dot(h_r.astype(bf16), wc1b_ref[...], preferred_element_type=f32)
           + bc1_ref[...])
    z1c = jnp.maximum(z1c, 0.0)
    # Dropout(0.3) is the identity at inference (eval mode); no RNG applied.
    # Final Linear(64,1): VPU multiply against the broadcast weight row + lane-sum
    # (avoids an N=1 MXU push/pop on the critical-path tail).
    z2c = jnp.sum(z1c * wc2_ref[...], axis=-1, keepdims=True) + bc2_ref[...]
    out_ref[...] = 0.5 * jnp.tanh(0.5 * z2c) + 0.5                # sigmoid via tanh


# ----------------------------------------------------------------------------- #
# Wrapper
# ----------------------------------------------------------------------------- #
def cnn_lstm_forward(x_nchw, kp):
    """Forward pass matching CNNLSTMClassifier.forward. Input NCHW, output (B, 1)."""
    B = x_nchw.shape[0]
    # Only wrapper prep left: squeeze the channel dim (free) and put time (w) on the row
    # axis.  Conv padding is absorbed into W1bd rows / in-kernel zero sublanes.
    # TODO(synk): the remaining tiny transpose could be folded into the pallas_call via
    #             CompilerParams(allow_input_fusion=...) if dispatch overhead matters.
    xT = jnp.swapaxes(x_nchw[:, 0].astype(jnp.float32), 1, 2)     # (B, W, H)

    vmem = pl.BlockSpec(memory_space=pltpu.MemorySpace.VMEM)
    hbm = pl.BlockSpec(memory_space=pl.ANY)                       # manual DMA inside kernel
    args = (xT, kp["w1bd"], kp["b1t"], kp["b2t"],
            kp["whh_f"], kp["bf"], kp["wih_r"], kp["br"],
            kp["wc1f"], kp["wc1b"], kp["bc1"], kp["wc2"], kp["bc2"],
            kp["w2bd"], kp["wih_f"])
    return pl.pallas_call(
        _fused_cnn_lstm_kernel,
        out_shape=jax.ShapeDtypeStruct((B, 1), jnp.float32),
        in_specs=[vmem] * 13 + [hbm, hbm],
        out_specs=vmem,
        scratch_shapes=[
            pltpu.VMEM(kp["w2bd"].shape, kp["w2bd"].dtype),       # w2bd landing buffer
            pltpu.VMEM(kp["wih_f"].shape, kp["wih_f"].dtype),     # wih_f landing buffer
            pltpu.SemaphoreType.DMA((2,)),
        ],
    )(*args)


# ----------------------------------------------------------------------------- #
# Deterministic parameter construction (synthetic, PyTorch shapes) + packing
# ----------------------------------------------------------------------------- #
def make_params(n_mfcc, time_steps, lstm_hidden):
    key = jax.random.PRNGKey(0)
    ks = jax.random.split(key, 20)
    H = lstm_hidden
    F = (n_mfcc // 4) * 32                      # lstm_input_size = h * c

    raw = dict(
        w1=0.3 * jax.random.normal(ks[0], (16, 1, 3, 3), jnp.float32),
        b1=0.1 * jax.random.normal(ks[1], (16,), jnp.float32),
        w2=0.1 * jax.random.normal(ks[2], (32, 16, 3, 3), jnp.float32),
        b2=0.1 * jax.random.normal(ks[3], (32,), jnp.float32),
        w_ih_f=0.1 * jax.random.normal(ks[4], (4 * H, F), jnp.float32),
        w_hh_f=0.1 * jax.random.normal(ks[5], (4 * H, H), jnp.float32),
        b_ih_f=0.1 * jax.random.normal(ks[6], (4 * H,), jnp.float32),
        b_hh_f=0.1 * jax.random.normal(ks[7], (4 * H,), jnp.float32),
        w_ih_r=0.1 * jax.random.normal(ks[8], (4 * H, F), jnp.float32),
        w_hh_r=0.1 * jax.random.normal(ks[9], (4 * H, H), jnp.float32),
        b_ih_r=0.1 * jax.random.normal(ks[10], (4 * H,), jnp.float32),
        b_hh_r=0.1 * jax.random.normal(ks[11], (4 * H,), jnp.float32),
        wc1=0.1 * jax.random.normal(ks[12], (64, 2 * H), jnp.float32),
        bc1=0.1 * jax.random.normal(ks[13], (64,), jnp.float32),
        wc2=0.1 * jax.random.normal(ks[14], (1, 64), jnp.float32),
        bc2=0.1 * jax.random.normal(ks[15], (1,), jnp.float32),
    )

    H1, W1 = n_mfcc, time_steps                 # 16, 16
    Ho1, Wo1 = H1 // 2, W1 // 2                 # 8, 8
    Ho2 = Ho1 // 2                              # 4
    C1, C2 = 16, 32

    w1 = np.asarray(raw["w1"])                  # (16, 1, 3, 3) [co, ci, kh, kw]
    w2 = np.asarray(raw["w2"])                  # (32, 16, 3, 3)

    # conv1 block weight with kh taps (and 'same' h zero-padding) absorbed:
    #   rows (kw, h_in) -> 3*H1 ; cols (ph, ho, co) -> 2*Ho1*C1.
    W1bd = np.zeros((3 * H1, 2 * Ho1 * C1), np.float32)
    for kw in range(3):
        for ph in range(2):
            for ho in range(Ho1):
                h_out = 2 * ho + ph
                col0 = ph * (Ho1 * C1) + ho * C1
                for kh in range(3):
                    h_in = h_out + kh - 1
                    if 0 <= h_in < H1:
                        W1bd[kw * H1 + h_in, col0:col0 + C1] = w1[:, 0, kh, kw]
    b1t = np.tile(np.asarray(raw["b1"]), Ho1).reshape(1, Ho1 * C1)

    # conv2 block weight with kh taps absorbed:
    #   rows (kw, h_in, ci) -> 3*Ho1*C1 ; cols (ph, ho, co) -> 2*Ho2*C2.
    W2bd = np.zeros((3 * Ho1 * C1, 2 * Ho2 * C2), np.float32)
    for kw in range(3):
        for ph in range(2):
            for ho in range(Ho2):
                h_out = 2 * ho + ph
                col0 = ph * (Ho2 * C2) + ho * C2
                for kh in range(3):
                    h_in = h_out + kh - 1
                    if 0 <= h_in < Ho1:
                        for ci in range(C1):
                            W2bd[kw * (Ho1 * C1) + h_in * C1 + ci,
                                 col0:col0 + C2] = w2[:, ci, kh, kw]
    b2t = np.tile(np.asarray(raw["b2"]), Ho2).reshape(1, Ho2 * C2)

    # LSTM input weights, rows permuted from torch's (c*Ho2 + h) order to the kernel's
    # (h*C2 + c) feature layout, transposed to (F, 4H).
    perm = np.array([co * Ho2 + ho for ho in range(Ho2) for co in range(C2)], np.int32)
    wih_f_perm = np.asarray(raw["w_ih_f"]).T[perm, :]
    wih_r_perm = np.asarray(raw["w_ih_r"]).T[perm, :]

    bf16 = jnp.bfloat16
    kp = dict(
        # bf16 matmul operands (f32 accumulation in-kernel); biases / VPU-tail weights stay f32.
        w1bd=jnp.asarray(W1bd, bf16), b1t=jnp.asarray(b1t),
        w2bd=jnp.asarray(W2bd, bf16), b2t=jnp.asarray(b2t),
        wih_f=jnp.asarray(wih_f_perm, bf16),
        whh_f=jnp.asarray(np.asarray(raw["w_hh_f"]).T, bf16),
        bf=jnp.asarray((np.asarray(raw["b_ih_f"]) + np.asarray(raw["b_hh_f"])).reshape(1, 4 * H)),
        wih_r=jnp.asarray(wih_r_perm, bf16),
        br=jnp.asarray((np.asarray(raw["b_ih_r"]) + np.asarray(raw["b_hh_r"])).reshape(1, 4 * H)),
        wc1f=jnp.asarray(np.asarray(raw["wc1"])[:, :H].T, bf16),
        wc1b=jnp.asarray(np.asarray(raw["wc1"])[:, H:].T, bf16),
        bc1=jnp.asarray(np.asarray(raw["bc1"]).reshape(1, 64)),
        wc2=jnp.asarray(np.asarray(raw["wc2"]).reshape(1, 64)),   # f32 row for the VPU tail
        bc2=jnp.asarray(np.asarray(raw["bc2"]).reshape(1, 1)),
    )
    return raw, kp


# ----------------------------------------------------------------------------- #
# Pure-JAX reference (mirrors the PyTorch forward exactly, f32) for validation
# ----------------------------------------------------------------------------- #
def reference_forward(x, raw, lstm_hidden):
    def conv(y, w, b):
        y = lax.conv_general_dilated(y, w, (1, 1), ((1, 1), (1, 1)),
                                     dimension_numbers=("NCHW", "OIHW", "NCHW"))
        return jnp.maximum(y + b.reshape(1, -1, 1, 1), 0.0)

    def pool(y):
        return lax.reduce_window(y, -jnp.inf, lax.max, (1, 1, 2, 2), (1, 1, 2, 2), "VALID")

    y = pool(conv(x, raw["w1"], raw["b1"]))
    y = pool(conv(y, raw["w2"], raw["b2"]))
    b_, c_, h_, w_ = y.shape
    rnn_in = jnp.transpose(y, (0, 3, 1, 2)).reshape(b_, w_, c_ * h_)

    H = lstm_hidden

    def cell(x_t, h, c, wih, whh, bih, bhh):
        g = x_t @ wih.T + h @ whh.T + bih + bhh
        i = jax.nn.sigmoid(g[:, :H]); f = jax.nn.sigmoid(g[:, H:2 * H])
        gg = jnp.tanh(g[:, 2 * H:3 * H]); o = jax.nn.sigmoid(g[:, 3 * H:])
        c = f * c + i * gg
        return o * jnp.tanh(c), c

    hf = jnp.zeros((b_, H)); cf = jnp.zeros((b_, H))
    for t in range(w_):
        hf, cf = cell(rnn_in[:, t, :], hf, cf,
                      raw["w_ih_f"], raw["w_hh_f"], raw["b_ih_f"], raw["b_hh_f"])
    hb, _ = cell(rnn_in[:, -1, :], jnp.zeros((b_, H)), jnp.zeros((b_, H)),
                 raw["w_ih_r"], raw["w_hh_r"], raw["b_ih_r"], raw["b_hh_r"])
    last = jnp.concatenate([hf, hb], axis=-1)
    z1 = jnp.maximum(last @ raw["wc1"].T + raw["bc1"], 0.0)
    return jax.nn.sigmoid(z1 @ raw["wc2"].T + raw["bc2"])


# ----------------------------------------------------------------------------- #
if __name__ == "__main__":
    B, n_mfcc, time_steps, lstm_hidden = 2, 16, 16, 32

    raw, kp = make_params(n_mfcc, time_steps, lstm_hidden)
    x = jax.random.normal(jax.random.PRNGKey(0), (B, 1, n_mfcc, time_steps), jnp.float32)

    out = jax.jit(lambda xx: cnn_lstm_forward(xx, kp))(x)
    out = jax.block_until_ready(out)

    ref = jax.block_until_ready(reference_forward(x, raw, lstm_hidden))

    assert out.shape == (B, 1), out.shape
    assert bool(jnp.all(jnp.isfinite(out)))
    # Tolerance widened from 5e-3 to 2e-2: matmul operands are bf16 (f32 accumulation),
    # while the reference runs entirely in f32.  Typical observed error is ~1e-3.
    np.testing.assert_allclose(np.asarray(out), np.asarray(ref), atol=2e-2, rtol=0)

    print("KERNEL_OK")
</pallas_src>

<mosaic_0001>
module attributes {stable_mosaic.version = 11 : i64} {
  func.func @_fused_cnn_lstm_kernel(%arg0: memref<2x16x16xf32, #tpu.memory_space<vmem>>, %arg1: memref<48x256xbf16, #tpu.memory_space<vmem>>, %arg2: memref<1x128xf32, #tpu.memory_space<vmem>>, %arg3: memref<1x128xf32, #tpu.memory_space<vmem>>, %arg4: memref<32x128xbf16, #tpu.memory_space<vmem>>, %arg5: memref<1x128xf32, #tpu.memory_space<vmem>>, %arg6: memref<128x128xbf16, #tpu.memory_space<vmem>>, %arg7: memref<1x128xf32, #tpu.memory_space<vmem>>, %arg8: memref<32x64xbf16, #tpu.memory_space<vmem>>, %arg9: memref<32x64xbf16, #tpu.memory_space<vmem>>, %arg10: memref<1x64xf32, #tpu.memory_space<vmem>>, %arg11: memref<1x64xf32, #tpu.memory_space<vmem>>, %arg12: memref<1x1xf32, #tpu.memory_space<vmem>>, %arg13: memref<384x256xbf16, #tpu.memory_space<any>>, %arg14: memref<128x128xbf16, #tpu.memory_space<any>>, %arg15: memref<2x1xf32, #tpu.memory_space<vmem>>, %arg16: memref<384x256xbf16, #tpu.memory_space<vmem>>, %arg17: memref<128x128xbf16, #tpu.memory_space<vmem>>, %arg18: memref<2x!tpu.dma_semaphore, #tpu.memory_space<semaphore_mem>>) attributes {dimension_semantics = [], scalar_prefetch = 0 : i64, scratch_operands = 3 : i64, tpu.core_type = #tpu.core_type<tc>} {
    %c0_i32 = arith.constant 0 : i32
    %0 = tpu.memref_slice %arg18[%c0_i32] : memref<2x!tpu.dma_semaphore, #tpu.memory_space<semaphore_mem>> -> memref<1x!tpu.dma_semaphore, #tpu.memory_space<semaphore_mem>>
    %1 = tpu.memref_squeeze %0 : memref<1x!tpu.dma_semaphore, #tpu.memory_space<semaphore_mem>> -> memref<!tpu.dma_semaphore, #tpu.memory_space<semaphore_mem>>
    tpu.enqueue_dma source(%arg13 : memref<384x256xbf16, #tpu.memory_space<any>>) target(%arg16 : memref<384x256xbf16, #tpu.memory_space<vmem>>) target_semaphore(%1 : memref<!tpu.dma_semaphore, #tpu.memory_space<semaphore_mem>>)
    %c1_i32 = arith.constant 1 : i32
    %2 = tpu.memref_slice %arg18[%c1_i32] : memref<2x!tpu.dma_semaphore, #tpu.memory_space<semaphore_mem>> -> memref<1x!tpu.dma_semaphore, #tpu.memory_space<semaphore_mem>>
    %3 = tpu.memref_squeeze %2 : memref<1x!tpu.dma_semaphore, #tpu.memory_space<semaphore_mem>> -> memref<!tpu.dma_semaphore, #tpu.memory_space<semaphore_mem>>
    tpu.enqueue_dma source(%arg14 : memref<128x128xbf16, #tpu.memory_space<any>>) target(%arg17 : memref<128x128xbf16, #tpu.memory_space<vmem>>) target_semaphore(%3 : memref<!tpu.dma_semaphore, #tpu.memory_space<semaphore_mem>>)
    %c0 = arith.constant 0 : index
    %c0_0 = arith.constant 0 : index
    %c0_1 = arith.constant 0 : index
    %4 = vector.load %arg0[%c0, %c0_0, %c0_1] : memref<2x16x16xf32, #tpu.memory_space<vmem>>, vector<2x16x16xf32>
    %cst = arith.constant 0.000000e+00 : f32
    %5 = vector.broadcast %cst : f32 to vector<2x1x16xf32>
    %6 = tpu.concatenate %5, %4, %5 in 1 : vector<2x1x16xf32>, vector<2x16x16xf32>, vector<2x1x16xf32> -> vector<2x18x16xf32>
    %7 = vector.extract_strided_slice %6 {offsets = [0, 0, 0], sizes = [2, 16, 16], strides = [1, 1, 1]} : vector<2x18x16xf32> to vector<2x16x16xf32>
    %8 = vector.extract_strided_slice %6 {offsets = [0, 1, 0], sizes = [2, 16, 16], strides = [1, 1, 1]} : vector<2x18x16xf32> to vector<2x16x16xf32>
    %9 = vector.extract_strided_slice %6 {offsets = [0, 2, 0], sizes = [2, 16, 16], strides = [1, 1, 1]} : vector<2x18x16xf32> to vector<2x16x16xf32>
    %10 = tpu.concatenate %7, %8, %9 in 2 : vector<2x16x16xf32>, vector<2x16x16xf32>, vector<2x16x16xf32> -> vector<2x16x48xf32>
    %11 = vector.shape_cast %10 : vector<2x16x48xf32> to vector<32x48xf32>
    %12 = arith.truncf %11 : vector<32x48xf32> to vector<32x48xbf16>
    %c0_2 = arith.constant 0 : index
    %c0_3 = arith.constant 0 : index
    %13 = vector.load %arg1[%c0_2, %c0_3] : memref<48x256xbf16, #tpu.memory_space<vmem>>, vector<48x256xbf16>
    %cst_4 = arith.constant dense<0.000000e+00> : vector<32x256xf32>
    %14 = tpu.matmul %12, %13, %cst_4 {dimension_numbers = #tpu.dot_dimension_numbers<[1], [0], [0], [1], [0, 0, 1, 1], [], []>} : vector<32x48xbf16>, vector<48x256xbf16>, vector<32x256xf32> -> vector<32x256xf32>
    %15 = vector.shape_cast %14 : vector<32x256xf32> to vector<16x2x256xf32>
    %cst_5 = arith.constant dense<0xFF800000> : vector<16x256xf32>
    %16 = vector.multi_reduction <maximumf>, %15, %cst_5 [1] : vector<16x2x256xf32> to vector<16x256xf32>
    %17 = vector.extract_strided_slice %16 {offsets = [0, 0], sizes = [16, 128], strides = [1, 1]} : vector<16x256xf32> to vector<16x128xf32>
    %18 = vector.extract_strided_slice %16 {offsets = [0, 128], sizes = [16, 128], strides = [1, 1]} : vector<16x256xf32> to vector<16x128xf32>
    %19 = arith.maximumf %17, %18 : vector<16x128xf32>
    %c0_6 = arith.constant 0 : index
    %c0_7 = arith.constant 0 : index
    %20 = vector.load %arg2[%c0_6, %c0_7] : memref<1x128xf32, #tpu.memory_space<vmem>>, vector<1x128xf32>
    %21 = vector.broadcast %20 : vector<1x128xf32> to vector<16x128xf32>
    %22 = arith.addf %19, %21 : vector<16x128xf32>
    %cst_8 = arith.constant 0.000000e+00 : f32
    %23 = vector.broadcast %cst_8 : f32 to vector<16x128xf32>
    %24 = arith.maximumf %22, %23 : vector<16x128xf32>
    %25 = vector.shape_cast %24 : vector<16x128xf32> to vector<2x8x128xf32>
    %cst_9 = arith.constant 0.000000e+00 : f32
    %26 = vector.broadcast %cst_9 : f32 to vector<2x1x128xf32>
    %27 = tpu.concatenate %26, %25, %26 in 1 : vector<2x1x128xf32>, vector<2x8x128xf32>, vector<2x1x128xf32> -> vector<2x10x128xf32>
    %28 = vector.extract_strided_slice %27 {offsets = [0, 0, 0], sizes = [2, 8, 128], strides = [1, 1, 1]} : vector<2x10x128xf32> to vector<2x8x128xf32>
    %29 = vector.extract_strided_slice %27 {offsets = [0, 1, 0], sizes = [2, 8, 128], strides = [1, 1, 1]} : vector<2x10x128xf32> to vector<2x8x128xf32>
    %30 = vector.extract_strided_slice %27 {offsets = [0, 2, 0], sizes = [2, 8, 128], strides = [1, 1, 1]} : vector<2x10x128xf32> to vector<2x8x128xf32>
    %31 = tpu.concatenate %28, %29, %30 in 2 : vector<2x8x128xf32>, vector<2x8x128xf32>, vector<2x8x128xf32> -> vector<2x8x384xf32>
    %32 = vector.shape_cast %31 : vector<2x8x384xf32> to vector<16x384xf32>
    %33 = arith.truncf %32 : vector<16x384xf32> to vector<16x384xbf16>
    %c0_i32_10 = arith.constant 0 : i32
    %34 = tpu.memref_slice %arg18[%c0_i32_10] : memref<2x!tpu.dma_semaphore, #tpu.memory_space<semaphore_mem>> -> memref<1x!tpu.dma_semaphore, #tpu.memory_space<semaphore_mem>>
    %35 = tpu.memref_squeeze %34 : memref<1x!tpu.dma_semaphore, #tpu.memory_space<semaphore_mem>> -> memref<!tpu.dma_semaphore, #tpu.memory_space<semaphore_mem>>
    tpu.wait_dma2 semaphore(%35 : memref<!tpu.dma_semaphore, #tpu.memory_space<semaphore_mem>>) src(%arg13 : memref<384x256xbf16, #tpu.memory_space<any>>) dst(%arg16 : memref<384x256xbf16, #tpu.memory_space<vmem>>)
    %c0_11 = arith.constant 0 : index
    %c0_12 = arith.constant 0 : index
    %36 = vector.load %arg16[%c0_11, %c0_12] : memref<384x256xbf16, #tpu.memory_space<vmem>>, vector<384x256xbf16>
    %cst_13 = arith.constant dense<0.000000e+00> : vector<16x256xf32>
    %37 = tpu.matmul %33, %36, %cst_13 {dimension_numbers = #tpu.dot_dimension_numbers<[1], [0], [0], [1], [0, 0, 1, 1], [], []>} : vector<16x384xbf16>, vector<384x256xbf16>, vector<16x256xf32> -> vector<16x256xf32>
    %38 = vector.shape_cast %37 : vector<16x256xf32> to vector<8x2x256xf32>
    %cst_14 = arith.constant dense<0xFF800000> : vector<8x256xf32>
    %39 = vector.multi_reduction <maximumf>, %38, %cst_14 [1] : vector<8x2x256xf32> to vector<8x256xf32>
    %40 = vector.extract_strided_slice %39 {offsets = [0, 0], sizes = [8, 128], strides = [1, 1]} : vector<8x256xf32> to vector<8x128xf32>
    %41 = vector.extract_strided_slice %39 {offsets = [0, 128], sizes = [8, 128], strides = [1, 1]} : vector<8x256xf32> to vector<8x128xf32>
    %42 = arith.maximumf %40, %41 : vector<8x128xf32>
    %c0_15 = arith.constant 0 : index
    %c0_16 = arith.constant 0 : index
    %43 = vector.load %arg3[%c0_15, %c0_16] : memref<1x128xf32, #tpu.memory_space<vmem>>, vector<1x128xf32>
    %44 = vector.broadcast %43 : vector<1x128xf32> to vector<8x128xf32>
    %45 = arith.addf %42, %44 : vector<8x128xf32>
    %cst_17 = arith.constant 0.000000e+00 : f32
    %46 = vector.broadcast %cst_17 : f32 to vector<8x128xf32>
    %47 = arith.maximumf %45, %46 : vector<8x128xf32>
    %c1_i32_18 = arith.constant 1 : i32
    %48 = tpu.memref_slice %arg18[%c1_i32_18] : memref<2x!tpu.dma_semaphore, #tpu.memory_space<semaphore_mem>> -> memref<1x!tpu.dma_semaphore, #tpu.memory_space<semaphore_mem>>
    %49 = tpu.memref_squeeze %48 : memref<1x!tpu.dma_semaphore, #tpu.memory_space<semaphore_mem>> -> memref<!tpu.dma_semaphore, #tpu.memory_space<semaphore_mem>>
    tpu.wait_dma2 semaphore(%49 : memref<!tpu.dma_semaphore, #tpu.memory_space<semaphore_mem>>) src(%arg14 : memref<128x128xbf16, #tpu.memory_space<any>>) dst(%arg17 : memref<128x128xbf16, #tpu.memory_space<vmem>>)
    %50 = arith.truncf %47 : vector<8x128xf32> to vector<8x128xbf16>
    %c0_19 = arith.constant 0 : index
    %c0_20 = arith.constant 0 : index
    %51 = vector.load %arg17[%c0_19, %c0_20] : memref<128x128xbf16, #tpu.memory_space<vmem>>, vector<128x128xbf16>
    %cst_21 = arith.constant dense<0.000000e+00> : vector<8x128xf32>
    %52 = tpu.matmul %50, %51, %cst_21 {dimension_numbers = #tpu.dot_dimension_numbers<[1], [0], [0], [1], [0, 0, 1, 1], [], []>} : vector<8x128xbf16>, vector<128x128xbf16>, vector<8x128xf32> -> vector<8x128xf32>
    %c0_22 = arith.constant 0 : index
    %c0_23 = arith.constant 0 : index
    %53 = vector.load %arg5[%c0_22, %c0_23] : memref<1x128xf32, #tpu.memory_space<vmem>>, vector<1x128xf32>
    %54 = vector.broadcast %53 : vector<1x128xf32> to vector<8x128xf32>
    %55 = arith.addf %52, %54 : vector<8x128xf32>
    %56 = vector.shape_cast %55 : vector<8x128xf32> to vector<2x4x128xf32>
    %57 = vector.shape_cast %47 : vector<8x128xf32> to vector<2x4x128xf32>
    %58 = vector.extract_strided_slice %57 {offsets = [0, 3, 0], sizes = [2, 1, 128], strides = [1, 1, 1]} : vector<2x4x128xf32> to vector<2x1x128xf32>
    %59 = vector.shape_cast %58 : vector<2x1x128xf32> to vector<2x128xf32>
    %60 = arith.truncf %59 : vector<2x128xf32> to vector<2x128xbf16>
    %c0_24 = arith.constant 0 : index
    %c0_25 = arith.constant 0 : index
    %61 = vector.load %arg6[%c0_24, %c0_25] : memref<128x128xbf16, #tpu.memory_space<vmem>>, vector<128x128xbf16>
    %cst_26 = arith.constant dense<0.000000e+00> : vector<2x128xf32>
    %62 = tpu.matmul %60, %61, %cst_26 {dimension_numbers = #tpu.dot_dimension_numbers<[1], [0], [0], [1], [0, 0, 1, 1], [], []>} : vector<2x128xbf16>, vector<128x128xbf16>, vector<2x128xf32> -> vector<2x128xf32>
    %c0_27 = arith.constant 0 : index
    %c0_28 = arith.constant 0 : index
    %63 = vector.load %arg7[%c0_27, %c0_28] : memref<1x128xf32, #tpu.memory_space<vmem>>, vector<1x128xf32>
    %64 = vector.broadcast %63 : vector<1x128xf32> to vector<2x128xf32>
    %65 = arith.addf %62, %64 : vector<2x128xf32>
    %66 = tpu.iota {dimensions = array<i32: 1>} : vector<2x128xi32>
    %c64_i32 = arith.constant 64 : i32
    %67 = vector.broadcast %c64_i32 : i32 to vector<2x128xi32>
    %68 = arith.cmpi sge, %66, %67 : vector<2x128xi32>
    %c96_i32 = arith.constant 96 : i32
    %69 = vector.broadcast %c96_i32 : i32 to vector<2x128xi32>
    %70 = arith.cmpi slt, %66, %69 : vector<2x128xi32>
    %71 = arith.andi %68, %70 : vector<2x128xi1>
    %cst_29 = arith.constant 1.000000e+00 : f32
    %cst_30 = arith.constant 5.000000e-01 : f32
    %72 = vector.broadcast %cst_29 : f32 to vector<2x128xf32>
    %73 = vector.broadcast %cst_30 : f32 to vector<2x128xf32>
    %74 = arith.select %71, %72, %73 : vector<2x128xi1>, vector<2x128xf32>
    %c0_31 = arith.constant 0 : index
    %c0_32 = arith.constant 0 : index
    %75 = vector.load %arg4[%c0_31, %c0_32] : memref<32x128xbf16, #tpu.memory_space<vmem>>, vector<32x128xbf16>
    %76 = vector.extract_strided_slice %56 {offsets = [0, 0, 0], sizes = [2, 1, 128], strides = [1, 1, 1]} : vector<2x4x128xf32> to vector<2x1x128xf32>
    %77 = vector.shape_cast %76 : vector<2x1x128xf32> to vector<2x128xf32>
    %78 = arith.mulf %77, %74 : vector<2x128xf32>
    %79 = math.tanh %78 : vector<2x128xf32>
    %cst_33 = arith.constant 5.000000e-01 : f32
    %80 = vector.broadcast %cst_33 : f32 to vector<2x128xf32>
    %81 = arith.mulf %80, %79 : vector<2x128xf32>
    %cst_34 = arith.constant 5.000000e-01 : f32
    %82 = vector.broadcast %cst_34 : f32 to vector<2x128xf32>
    %83 = arith.addf %81, %82 : vector<2x128xf32>
    %84 = arith.select %71, %79, %83 : vector<2x128xi1>, vector<2x128xf32>
    %85 = vector.extract_strided_slice %84 {offsets = [0, 0], sizes = [2, 32], strides = [1, 1]} : vector<2x128xf32> to vector<2x32xf32>
    %86 = vector.extract_strided_slice %84 {offsets = [0, 64], sizes = [2, 32], strides = [1, 1]} : vector<2x128xf32> to vector<2x32xf32>
    %87 = arith.mulf %85, %86 : vector<2x32xf32>
    %88 = vector.extract_strided_slice %84 {offsets = [0, 96], sizes = [2, 32], strides = [1, 1]} : vector<2x128xf32> to vector<2x32xf32>
    %89 = math.tanh %87 : vector<2x32xf32>
    %90 = arith.mulf %88, %89 : vector<2x32xf32>
    %91 = vector.extract_strided_slice %56 {offsets = [0, 1, 0], sizes = [2, 1, 128], strides = [1, 1, 1]} : vector<2x4x128xf32> to vector<2x1x128xf32>
    %92 = vector.shape_cast %91 : vector<2x1x128xf32> to vector<2x128xf32>
    %93 = arith.truncf %90 : vector<2x32xf32> to vector<2x32xbf16>
    %cst_35 = arith.constant dense<0.000000e+00> : vector<2x128xf32>
    %94 = tpu.matmul %93, %75, %cst_35 {dimension_numbers = #tpu.dot_dimension_numbers<[1], [0], [0], [1], [0, 0, 1, 1], [], []>} : vector<2x32xbf16>, vector<32x128xbf16>, vector<2x128xf32> -> vector<2x128xf32>
    %95 = arith.addf %92, %94 : vector<2x128xf32>
    %96 = arith.mulf %95, %74 : vector<2x128xf32>
    %97 = math.tanh %96 : vector<2x128xf32>
    %cst_36 = arith.constant 5.000000e-01 : f32
    %98 = vector.broadcast %cst_36 : f32 to vector<2x128xf32>
    %99 = arith.mulf %98, %97 : vector<2x128xf32>
    %cst_37 = arith.constant 5.000000e-01 : f32
    %100 = vector.broadcast %cst_37 : f32 to vector<2x128xf32>
    %101 = arith.addf %99, %100 : vector<2x128xf32>
    %102 = arith.select %71, %97, %101 : vector<2x128xi1>, vector<2x128xf32>
    %103 = vector.extract_strided_slice %102 {offsets = [0, 32], sizes = [2, 32], strides = [1, 1]} : vector<2x128xf32> to vector<2x32xf32>
    %104 = arith.mulf %103, %87 : vector<2x32xf32>
    %105 = vector.extract_strided_slice %102 {offsets = [0, 0], sizes = [2, 32], strides = [1, 1]} : vector<2x128xf32> to vector<2x32xf32>
    %106 = vector.extract_strided_slice %102 {offsets = [0, 64], sizes = [2, 32], strides = [1, 1]} : vector<2x128xf32> to vector<2x32xf32>
    %107 = arith.mulf %105, %106 : vector<2x32xf32>
    %108 = arith.addf %104, %107 : vector<2x32xf32>
    %109 = vector.extract_strided_slice %102 {offsets = [0, 96], sizes = [2, 32], strides = [1, 1]} : vector<2x128xf32> to vector<2x32xf32>
    %110 = math.tanh %108 : vector<2x32xf32>
    %111 = arith.mulf %109, %110 : vector<2x32xf32>
    %112 = vector.extract_strided_slice %56 {offsets = [0, 2, 0], sizes = [2, 1, 128], strides = [1, 1, 1]} : vector<2x4x128xf32> to vector<2x1x128xf32>
    %113 = vector.shape_cast %112 : vector<2x1x128xf32> to vector<2x128xf32>
    %114 = arith.truncf %111 : vector<2x32xf32> to vector<2x32xbf16>
    %cst_38 = arith.constant dense<0.000000e+00> : vector<2x128xf32>
    %115 = tpu.matmul %114, %75, %cst_38 {dimension_numbers = #tpu.dot_dimension_numbers<[1], [0], [0], [1], [0, 0, 1, 1], [], []>} : vector<2x32xbf16>, vector<32x128xbf16>, vector<2x128xf32> -> vector<2x128xf32>
    %116 = arith.addf %113, %115 : vector<2x128xf32>
    %117 = arith.mulf %116, %74 : vector<2x128xf32>
    %118 = math.tanh %117 : vector<2x128xf32>
    %cst_39 = arith.constant 5.000000e-01 : f32
    %119 = vector.broadcast %cst_39 : f32 to vector<2x128xf32>
    %120 = arith.mulf %119, %118 : vector<2x128xf32>
    %cst_40 = arith.constant 5.000000e-01 : f32
    %121 = vector.broadcast %cst_40 : f32 to vector<2x128xf32>
    %122 = arith.addf %120, %121 : vector<2x128xf32>
    %123 = arith.select %71, %118, %122 : vector<2x128xi1>, vector<2x128xf32>
    %124 = vector.extract_strided_slice %123 {offsets = [0, 32], sizes = [2, 32], strides = [1, 1]} : vector<2x128xf32> to vector<2x32xf32>
    %125 = arith.mulf %124, %108 : vector<2x32xf32>
    %126 = vector.extract_strided_slice %123 {offsets = [0, 0], sizes = [2, 32], strides = [1, 1]} : vector<2x128xf32> to vector<2x32xf32>
    %127 = vector.extract_strided_slice %123 {offsets = [0, 64], sizes = [2, 32], strides = [1, 1]} : vector<2x128xf32> to vector<2x32xf32>
    %128 = arith.mulf %126, %127 : vector<2x32xf32>
    %129 = arith.addf %125, %128 : vector<2x32xf32>
    %130 = vector.extract_strided_slice %123 {offsets = [0, 96], sizes = [2, 32], strides = [1, 1]} : vector<2x128xf32> to vector<2x32xf32>
    %131 = math.tanh %129 : vector<2x32xf32>
    %132 = arith.mulf %130, %131 : vector<2x32xf32>
    %133 = vector.extract_strided_slice %56 {offsets = [0, 3, 0], sizes = [2, 1, 128], strides = [1, 1, 1]} : vector<2x4x128xf32> to vector<2x1x128xf32>
    %134 = vector.shape_cast %133 : vector<2x1x128xf32> to vector<2x128xf32>
    %135 = arith.truncf %132 : vector<2x32xf32> to vector<2x32xbf16>
    %cst_41 = arith.constant dense<0.000000e+00> : vector<2x128xf32>
    %136 = tpu.matmul %135, %75, %cst_41 {dimension_numbers = #tpu.dot_dimension_numbers<[1], [0], [0], [1], [0, 0, 1, 1], [], []>} : vector<2x32xbf16>, vector<32x128xbf16>, vector<2x128xf32> -> vector<2x128xf32>
    %137 = arith.addf %134, %136 : vector<2x128xf32>
    %138 = arith.mulf %137, %74 : vector<2x128xf32>
    %139 = math.tanh %138 : vector<2x128xf32>
    %cst_42 = arith.constant 5.000000e-01 : f32
    %140 = vector.broadcast %cst_42 : f32 to vector<2x128xf32>
    %141 = arith.mulf %140, %139 : vector<2x128xf32>
    %cst_43 = arith.constant 5.000000e-01 : f32
    %142 = vector.broadcast %cst_43 : f32 to vector<2x128xf32>
    %143 = arith.addf %141, %142 : vector<2x128xf32>
    %144 = arith.select %71, %139, %143 : vector<2x128xi1>, vector<2x128xf32>
    %145 = vector.extract_strided_slice %144 {offsets = [0, 32], sizes = [2, 32], strides = [1, 1]} : vector<2x128xf32> to vector<2x32xf32>
    %146 = arith.mulf %145, %129 : vector<2x32xf32>
    %147 = vector.extract_strided_slice %144 {offsets = [0, 0], sizes = [2, 32], strides = [1, 1]} : vector<2x128xf32> to vector<2x32xf32>
    %148 = vector.extract_strided_slice %144 {offsets = [0, 64], sizes = [2, 32], strides = [1, 1]} : vector<2x128xf32> to vector<2x32xf32>
    %149 = arith.mulf %147, %148 : vector<2x32xf32>
    %150 = arith.addf %146, %149 : vector<2x32xf32>
    %151 = vector.extract_strided_slice %144 {offsets = [0, 96], sizes = [2, 32], strides = [1, 1]} : vector<2x128xf32> to vector<2x32xf32>
    %152 = math.tanh %150 : vector<2x32xf32>
    %153 = arith.mulf %151, %152 : vector<2x32xf32>
    %154 = arith.mulf %65, %74 : vector<2x128xf32>
    %155 = math.tanh %154 : vector<2x128xf32>
    %cst_44 = arith.constant 5.000000e-01 : f32
    %156 = vector.broadcast %cst_44 : f32 to vector<2x128xf32>
    %157 = arith.mulf %156, %155 : vector<2x128xf32>
    %cst_45 = arith.constant 5.000000e-01 : f32
    %158 = vector.broadcast %cst_45 : f32 to vector<2x128xf32>
    %159 = arith.addf %157, %158 : vector<2x128xf32>
    %160 = arith.select %71, %155, %159 : vector<2x128xi1>, vector<2x128xf32>
    %161 = vector.extract_strided_slice %160 {offsets = [0, 0], sizes = [2, 32], strides = [1, 1]} : vector<2x128xf32> to vector<2x32xf32>
    %162 = vector.extract_strided_slice %160 {offsets = [0, 64], sizes = [2, 32], strides = [1, 1]} : vector<2x128xf32> to vector<2x32xf32>
    %163 = arith.mulf %161, %162 : vector<2x32xf32>
    %164 = vector.extract_strided_slice %160 {offsets = [0, 96], sizes = [2, 32], strides = [1, 1]} : vector<2x128xf32> to vector<2x32xf32>
    %165 = math.tanh %163 : vector<2x32xf32>
    %166 = arith.mulf %164, %165 : vector<2x32xf32>
    %167 = arith.truncf %153 : vector<2x32xf32> to vector<2x32xbf16>
    %c0_46 = arith.constant 0 : index
    %c0_47 = arith.constant 0 : index
    %168 = vector.load %arg8[%c0_46, %c0_47] : memref<32x64xbf16, #tpu.memory_space<vmem>>, vector<32x64xbf16>
    %cst_48 = arith.constant dense<0.000000e+00> : vector<2x64xf32>
    %169 = tpu.matmul %167, %168, %cst_48 {dimension_numbers = #tpu.dot_dimension_numbers<[1], [0], [0], [1], [0, 0, 1, 1], [], []>} : vector<2x32xbf16>, vector<32x64xbf16>, vector<2x64xf32> -> vector<2x64xf32>
    %170 = arith.truncf %166 : vector<2x32xf32> to vector<2x32xbf16>
    %c0_49 = arith.constant 0 : index
    %c0_50 = arith.constant 0 : index
    %171 = vector.load %arg9[%c0_49, %c0_50] : memref<32x64xbf16, #tpu.memory_space<vmem>>, vector<32x64xbf16>
    %cst_51 = arith.constant dense<0.000000e+00> : vector<2x64xf32>
    %172 = tpu.matmul %170, %171, %cst_51 {dimension_numbers = #tpu.dot_dimension_numbers<[1], [0], [0], [1], [0, 0, 1, 1], [], []>} : vector<2x32xbf16>, vector<32x64xbf16>, vector<2x64xf32> -> vector<2x64xf32>
    %173 = arith.addf %169, %172 : vector<2x64xf32>
    %c0_52 = arith.constant 0 : index
    %c0_53 = arith.constant 0 : index
    %174 = vector.load %arg10[%c0_52, %c0_53] : memref<1x64xf32, #tpu.memory_space<vmem>>, vector<1x64xf32>
    %175 = vector.broadcast %174 : vector<1x64xf32> to vector<2x64xf32>
    %176 = arith.addf %173, %175 : vector<2x64xf32>
    %cst_54 = arith.constant 0.000000e+00 : f32
    %177 = vector.broadcast %cst_54 : f32 to vector<2x64xf32>
    %178 = arith.maximumf %176, %177 : vector<2x64xf32>
    %c0_55 = arith.constant 0 : index
    %c0_56 = arith.constant 0 : index
    %179 = vector.load %arg11[%c0_55, %c0_56] : memref<1x64xf32, #tpu.memory_space<vmem>>, vector<1x64xf32>
    %180 = vector.broadcast %179 : vector<1x64xf32> to vector<2x64xf32>
    %181 = arith.mulf %178, %180 : vector<2x64xf32>
    %cst_57 = arith.constant dense<0.000000e+00> : vector<2xf32>
    %182 = vector.multi_reduction <add>, %181, %cst_57 [1] : vector<2x64xf32> to vector<2xf32>
    %183 = vector.shape_cast %182 : vector<2xf32> to vector<2x1xf32>
    %c0_58 = arith.constant 0 : index
    %c0_59 = arith.constant 0 : index
    %184 = vector.load %arg12[%c0_58, %c0_59] : memref<1x1xf32, #tpu.memory_space<vmem>>, vector<1x1xf32>
    %185 = vector.broadcast %184 : vector<1x1xf32> to vector<2x1xf32>
    %186 = arith.addf %183, %185 : vector<2x1xf32>
    %cst_60 = arith.constant 5.000000e-01 : f32
    %187 = vector.broadcast %cst_60 : f32 to vector<2x1xf32>
    %188 = arith.mulf %187, %186 : vector<2x1xf32>
    %189 = math.tanh %188 : vector<2x1xf32>
    %cst_61 = arith.constant 5.000000e-01 : f32
    %190 = vector.broadcast %cst_61 : f32 to vector<2x1xf32>
    %191 = arith.mulf %190, %189 : vector<2x1xf32>
    %cst_62 = arith.constant 5.000000e-01 : f32
    %192 = vector.broadcast %cst_62 : f32 to vector<2x1xf32>
    %193 = arith.addf %191, %192 : vector<2x1xf32>
    %c0_63 = arith.constant 0 : index
    %c0_64 = arith.constant 0 : index
    %194 = vector.load %arg15[%c0_63, %c0_64] : memref<2x1xf32, #tpu.memory_space<vmem>>, vector<2x1xf32>
    tpu.vector_store %arg15[%c0_63, %c0_64], %193 {strides = array<i32>} : memref<2x1xf32, #tpu.memory_space<vmem>>, vector<2x1xf32>,
    return
  }
}

</mosaic_0001>

<bundles_post_ra>
// kernel: _lambda_.1
= control target key start
LH: loop header
LB: loop body
LE: loop exit
PB: predicated region body
PF: predicated region fallthrough
CT: control target
= control target key end

     0   :  { %s3645_s0 = inlined_call_operand.vmem [shape: f32[2,16,16], index: 0, kind: input, shape index: {}]   ;;  %s3646_s1 = inlined_call_operand.vmem [shape: bf16[48,256], index: 1, kind: input, shape index: {}]   ;;  %s3647_s2 = inlined_call_operand.vmem [shape: f32[1,128], index: 2, kind: input, shape index: {}]   ;;  %s3648_s3 = inlined_call_operand.vmem [shape: f32[1,128], index: 3, kind: input, shape index: {}]   ;;  %s3649_s4 = inlined_call_operand.vmem [shape: bf16[32,128], index: 4, kind: input, shape index: {}]   ;;  %s3650_s5 = inlined_call_operand.vmem [shape: f32[1,128], index: 5, kind: input, shape index: {}]   ;;  %s3651_s6 = inlined_call_operand.vmem [shape: bf16[128,128], index: 6, kind: input, shape index: {}]   ;;  %s3652_s7 = inlined_call_operand.vmem [shape: f32[1,128], index: 7, kind: input, shape index: {}]   ;;  %s3653_s8 = inlined_call_operand.vmem [shape: bf16[32,64], index: 8, kind: input, shape index: {}]   ;;  %s3654_s9 = inlined_call_operand.vmem [shape: bf16[32,64], index: 9, kind: input, shape index: {}]   ;;  %s3655_s10 = inlined_call_operand.vmem [shape: f32[1,64], index: 10, kind: input, shape index: {}]   ;;  %s3656_s11 = inlined_call_operand.vmem [shape: f32[1,64], index: 11, kind: input, shape index: {}]   ;;  %s3657_s12 = inlined_call_operand.<no memory space> [shape: f32[1,1], index: 12, kind: input, shape index: {}]   ;;  %s3658_s14 = inlined_call_operand.vmem [shape: bf16[128,128], index: 14, kind: input, shape index: {}]   ;;  %s3659_s15 = inlined_call_operand.vmem [shape: f32[2,1], index: 15, kind: output, shape index: {}]   ;;  %s3660_s13 = inlined_call_operand.vmem [shape: bf16[384,256], index: 13, kind: input, shape index: {}]  }
   0x1   :  { %v20_v0 = vstv %s3657_s12  ;;  %v66_v1 = vld [vmem:[%s3660_s13] sm:$0xf]  ;;  %v68_v2 = vld [vmem:[%s3660_s13 + $0x8] sm:$0xf]  ;;  %v70_v3 = vld [vmem:[%s3660_s13 + $0x4] sm:$0xf] }
   0x2   :  { %21 = vst [vmem:[#allocation5] sm:$0x1] %v20_v0  ;;  %67 = vst [vmem:[#allocation2] sm:$0xf] %v66_v1  ;;  %v72_v4 = vld [vmem:[%s3660_s13 + $0xc] sm:$0xff]   ;;  %v80_v7 = vld [vmem:[%s3660_s13 + $0x1c] sm:$0xff]  }
   0x3   :  { %69 = vst [vmem:[#allocation2 + $0x4] sm:$0xf] %v68_v2  ;;  %71 = vst [vmem:[#allocation2 + $0x8] sm:$0xf] %v70_v3  ;;  %v76_v5 = vld [vmem:[%s3660_s13 + $0x18] sm:$0xf] }
   0x4   :  { %v78_v6 = vld [vmem:[%s3660_s13 + $0x14] sm:$0xf]  ;;  %73 = vst [vmem:[#allocation2 + $0xc] sm:$0xff] %v72_v4   ;;  %77 = vst [vmem:[#allocation2 + $0x14] sm:$0xf] %v76_v5  ;;  %v88_v10 = vld [vmem:[%s3660_s13 + $0x2c] sm:$0xff]  }
   0x5   :  { %79 = vst [vmem:[#allocation2 + $0x18] sm:$0xf] %v78_v6  ;;  %v84_v8 = vld [vmem:[%s3660_s13 + $0x28] sm:$0xf]  ;;  %v86_v9 = vld [vmem:[%s3660_s13 + $0x24] sm:$0xf] }
   0x6   :  { %81 = vst [vmem:[#allocation2 + $0x1c] sm:$0xff] %v80_v7   ;;  %85 = vst [vmem:[#allocation2 + $0x24] sm:$0xf] %v84_v8  ;;  %v92_v11 = vld [vmem:[%s3660_s13 + $0x38] sm:$0xf]  ;;  %v96_v13 = vld [vmem:[%s3660_s13 + $0x3c] sm:$0xff]  }
   0x7   :  { %87 = vst [vmem:[#allocation2 + $0x28] sm:$0xf] %v86_v9  ;;  %v94_v12 = vld [vmem:[%s3660_s13 + $0x34] sm:$0xf]  ;;  %89 = vst [vmem:[#allocation2 + $0x2c] sm:$0xff] %v88_v10   ;;  %v104_v16 = vld [vmem:[%s3660_s13 + $0x4c] sm:$0xff]  }
   0x8   :  { %93 = vst [vmem:[#allocation2 + $0x34] sm:$0xf] %v92_v11  ;;  %95 = vst [vmem:[#allocation2 + $0x38] sm:$0xf] %v94_v12  ;;  %v100_v14 = vld [vmem:[%s3660_s13 + $0x48] sm:$0xf] }
   0x9   :  { %v102_v15 = vld [vmem:[%s3660_s13 + $0x44] sm:$0xf]  ;;  %97 = vst [vmem:[#allocation2 + $0x3c] sm:$0xff] %v96_v13   ;;  %101 = vst [vmem:[#allocation2 + $0x44] sm:$0xf] %v100_v14  ;;  %v112_v19 = vld [vmem:[%s3660_s13 + $0x5c] sm:$0xff]  }
   0xa   :  { %103 = vst [vmem:[#allocation2 + $0x48] sm:$0xf] %v102_v15  ;;  %v108_v17 = vld [vmem:[%s3660_s13 + $0x58] sm:$0xf]  ;;  %v110_v18 = vld [vmem:[%s3660_s13 + $0x54] sm:$0xf] }
   0xb   :  { %105 = vst [vmem:[#allocation2 + $0x4c] sm:$0xff] %v104_v16   ;;  %109 = vst [vmem:[#allocation2 + $0x54] sm:$0xf] %v108_v17  ;;  %v116_v20 = vld [vmem:[%s3660_s13 + $0x68] sm:$0xf]  ;;  %v120_v22 = vld [vmem:[%s3660_s13 + $0x6c] sm:$0xff]  }
   0xc   :  { %111 = vst [vmem:[#allocation2 + $0x58] sm:$0xf] %v110_v18  ;;  %v118_v21 = vld [vmem:[%s3660_s13 + $0x64] sm:$0xf]  ;;  %113 = vst [vmem:[#allocation2 + $0x5c] sm:$0xff] %v112_v19   ;;  %v128_v25 = vld [vmem:[%s3660_s13 + $0x7c] sm:$0xff]  }
   0xd   :  { %117 = vst [vmem:[#allocation2 + $0x64] sm:$0xf] %v116_v20  ;;  %119 = vst [vmem:[#allocation2 + $0x68] sm:$0xf] %v118_v21  ;;  %v124_v23 = vld [vmem:[%s3660_s13 + $0x78] sm:$0xf] }
   0xe   :  { %v126_v24 = vld [vmem:[%s3660_s13 + $0x74] sm:$0xf]  ;;  %121 = vst [vmem:[#allocation2 + $0x6c] sm:$0xff] %v120_v22   ;;  %125 = vst [vmem:[#allocation2 + $0x74] sm:$0xf] %v124_v23  ;;  %v136_v28 = vld [vmem:[%s3660_s13 + $0x8c] sm:$0xff]  }
   0xf   :  { %127 = vst [vmem:[#allocation2 + $0x78] sm:$0xf] %v126_v24  ;;  %v132_v26 = vld [vmem:[%s3660_s13 + $0x88] sm:$0xf]  ;;  %v134_v27 = vld [vmem:[%s3660_s13 + $0x84] sm:$0xf] }
  0x10   :  { %129 = vst [vmem:[#allocation2 + $0x7c] sm:$0xff] %v128_v25   ;;  %133 = vst [vmem:[#allocation2 + $0x84] sm:$0xf] %v132_v26  ;;  %v140_v29 = vld [vmem:[%s3660_s13 + $0x98] sm:$0xf]  ;;  %v144_v31 = vld [vmem:[%s3660_s13 + $0x9c] sm:$0xff]  }
  0x11   :  { %135 = vst [vmem:[#allocation2 + $0x88] sm:$0xf] %v134_v27  ;;  %v142_v30 = vld [vmem:[%s3660_s13 + $0x94] sm:$0xf]  ;;  %137 = vst [vmem:[#allocation2 + $0x8c] sm:$0xff] %v136_v28   ;;  %v152_v34 = vld [vmem:[%s3660_s13 + $0xac] sm:$0xff]  }
  0x12   :  { %141 = vst [vmem:[#allocation2 + $0x94] sm:$0xf] %v140_v29  ;;  %143 = vst [vmem:[#allocation2 + $0x98] sm:$0xf] %v142_v30  ;;  %v148_v32 = vld [vmem:[%s3660_s13 + $0xa8] sm:$0xf] }
  0x13   :  { %v150_v33 = vld [vmem:[%s3660_s13 + $0xa4] sm:$0xf]  ;;  %145 = vst [vmem:[#allocation2 + $0x9c] sm:$0xff] %v144_v31   ;;  %149 = vst [vmem:[#allocation2 + $0xa4] sm:$0xf] %v148_v32  ;;  %v160_v37 = vld [vmem:[%s3660_s13 + $0xbc] sm:$0xff]  }
  0x14   :  { %151 = vst [vmem:[#allocation2 + $0xa8] sm:$0xf] %v150_v33  ;;  %v156_v35 = vld [vmem:[%s3660_s13 + $0xb8] sm:$0xf]  ;;  %v158_v36 = vld [vmem:[%s3660_s13 + $0xb4] sm:$0xf] }
  0x15   :  { %153 = vst [vmem:[#allocation2 + $0xac] sm:$0xff] %v152_v34   ;;  %157 = vst [vmem:[#allocation2 + $0xb4] sm:$0xf] %v156_v35  ;;  %v164_v38 = vld [vmem:[%s3660_s13 + $0xc8] sm:$0xf]  ;;  %v168_v40 = vld [vmem:[%s3660_s13 + $0xcc] sm:$0xff]  }
  0x16   :  { %159 = vst [vmem:[#allocation2 + $0xb8] sm:$0xf] %v158_v36  ;;  %v166_v39 = vld [vmem:[%s3660_s13 + $0xc4] sm:$0xf]  ;;  %161 = vst [vmem:[#allocation2 + $0xbc] sm:$0xff] %v160_v37   ;;  %v176_v43 = vld [vmem:[%s3660_s13 + $0xdc] sm:$0xff]  }
  0x17   :  { %165 = vst [vmem:[#allocation2 + $0xc4] sm:$0xf] %v164_v38  ;;  %167 = vst [vmem:[#allocation2 + $0xc8] sm:$0xf] %v166_v39  ;;  %v172_v41 = vld [vmem:[%s3660_s13 + $0xd8] sm:$0xf] }
  0x18   :  { %v174_v42 = vld [vmem:[%s3660_s13 + $0xd4] sm:$0xf]  ;;  %169 = vst [vmem:[#allocation2 + $0xcc] sm:$0xff] %v168_v40   ;;  %173 = vst [vmem:[#allocation2 + $0xd4] sm:$0xf] %v172_v41  ;;  %v184_v46 = vld [vmem:[%s3660_s13 + $0xec] sm:$0xff]  }
  0x19   :  { %175 = vst [vmem:[#allocation2 + $0xd8] sm:$0xf] %v174_v42  ;;  %v180_v44 = vld [vmem:[%s3660_s13 + $0xe8] sm:$0xf]  ;;  %v182_v45 = vld [vmem:[%s3660_s13 + $0xe4] sm:$0xf] }
  0x1a   :  { %177 = vst [vmem:[#allocation2 + $0xdc] sm:$0xff] %v176_v43   ;;  %181 = vst [vmem:[#allocation2 + $0xe4] sm:$0xf] %v180_v44  ;;  %v188_v47 = vld [vmem:[%s3660_s13 + $0xf8] sm:$0xf]  ;;  %v192_v49 = vld [vmem:[%s3660_s13 + $0xfc] sm:$0xff]  }
  0x1b   :  { %183 = vst [vmem:[#allocation2 + $0xe8] sm:$0xf] %v182_v45  ;;  %v190_v48 = vld [vmem:[%s3660_s13 + $0xf4] sm:$0xf]  ;;  %185 = vst [vmem:[#allocation2 + $0xec] sm:$0xff] %v184_v46   ;;  %v200_v52 = vld [vmem:[%s3660_s13 + $0x10c] sm:$0xff]  }
  0x1c   :  { %189 = vst [vmem:[#allocation2 + $0xf4] sm:$0xf] %v188_v47  ;;  %191 = vst [vmem:[#allocation2 + $0xf8] sm:$0xf] %v190_v48  ;;  %v196_v50 = vld [vmem:[%s3660_s13 + $0x108] sm:$0xf] }
  0x1d   :  { %v198_v51 = vld [vmem:[%s3660_s13 + $0x104] sm:$0xf]  ;;  %193 = vst [vmem:[#allocation2 + $0xfc] sm:$0xff] %v192_v49   ;;  %197 = vst [vmem:[#allocation2 + $0x104] sm:$0xf] %v196_v50  ;;  %v208_v55 = vld [vmem:[%s3660_s13 + $0x11c] sm:$0xff]  }
  0x1e   :  { %199 = vst [vmem:[#allocation2 + $0x108] sm:$0xf] %v198_v51  ;;  %v204_v53 = vld [vmem:[%s3660_s13 + $0x118] sm:$0xf]  ;;  %v206_v54 = vld [vmem:[%s3660_s13 + $0x114] sm:$0xf] }
  0x1f   :  { %201 = vst [vmem:[#allocation2 + $0x10c] sm:$0xff] %v200_v52   ;;  %205 = vst [vmem:[#allocation2 + $0x114] sm:$0xf] %v204_v53  ;;  %v212_v56 = vld [vmem:[%s3660_s13 + $0x128] sm:$0xf]  ;;  %v216_v58 = vld [vmem:[%s3660_s13 + $0x12c] sm:$0xff]  }
  0x20   :  { %207 = vst [vmem:[#allocation2 + $0x118] sm:$0xf] %v206_v54  ;;  %v214_v57 = vld [vmem:[%s3660_s13 + $0x124] sm:$0xf]  ;;  %209 = vst [vmem:[#allocation2 + $0x11c] sm:$0xff] %v208_v55   ;;  %v224_v61 = vld [vmem:[%s3660_s13 + $0x13c] sm:$0xff]  }
  0x21   :  { %213 = vst [vmem:[#allocation2 + $0x124] sm:$0xf] %v212_v56  ;;  %215 = vst [vmem:[#allocation2 + $0x128] sm:$0xf] %v214_v57  ;;  %v220_v59 = vld [vmem:[%s3660_s13 + $0x138] sm:$0xf] }
  0x22   :  { %v222_v60 = vld [vmem:[%s3660_s13 + $0x134] sm:$0xf]  ;;  %217 = vst [vmem:[#allocation2 + $0x12c] sm:$0xff] %v216_v58   ;;  %221 = vst [vmem:[#allocation2 + $0x134] sm:$0xf] %v220_v59  ;;  %v232_v0 = vld [vmem:[%s3660_s13 + $0x14c] sm:$0xff]  }
  0x23   :  { %223 = vst [vmem:[#allocation2 + $0x138] sm:$0xf] %v222_v60  ;;  %v228_v62 = vld [vmem:[%s3660_s13 + $0x148] sm:$0xf]  ;;  %v230_v63 = vld [vmem:[%s3660_s13 + $0x144] sm:$0xf] }
  0x24   :  { %225 = vst [vmem:[#allocation2 + $0x13c] sm:$0xff] %v224_v61   ;;  %229 = vst [vmem:[#allocation2 + $0x144] sm:$0xf] %v228_v62  ;;  %v236_v1 = vld [vmem:[%s3660_s13 + $0x158] sm:$0xf]  ;;  %v240_v3 = vld [vmem:[%s3660_s13 + $0x15c] sm:$0xff]  }
  0x25   :  { %231 = vst [vmem:[#allocation2 + $0x148] sm:$0xf] %v230_v63  ;;  %v238_v2 = vld [vmem:[%s3660_s13 + $0x154] sm:$0xf]  ;;  %233 = vst [vmem:[#allocation2 + $0x14c] sm:$0xff] %v232_v0   ;;  %v248_v6 = vld [vmem:[%s3660_s13 + $0x16c] sm:$0xff]  }
  0x26   :  { %237 = vst [vmem:[#allocation2 + $0x154] sm:$0xf] %v236_v1  ;;  %239 = vst [vmem:[#allocation2 + $0x158] sm:$0xf] %v238_v2  ;;  %v244_v4 = vld [vmem:[%s3660_s13 + $0x168] sm:$0xf] }
  0x27   :  { %v246_v5 = vld [vmem:[%s3660_s13 + $0x164] sm:$0xf]  ;;  %241 = vst [vmem:[#allocation2 + $0x15c] sm:$0xff] %v240_v3   ;;  %245 = vst [vmem:[#allocation2 + $0x164] sm:$0xf] %v244_v4 }
  0x28   :  { %247 = vst [vmem:[#allocation2 + $0x168] sm:$0xf] %v246_v5  ;;  %v252_v7 = vld [vmem:[%s3660_s13 + $0x178] sm:$0xf]  ;;  %v254_v8 = vld [vmem:[%s3660_s13 + $0x174] sm:$0xf] }
  0x29   :  { %249 = vst [vmem:[#allocation2 + $0x16c] sm:$0xff] %v248_v6   ;;  %253 = vst [vmem:[#allocation2 + $0x174] sm:$0xf] %v252_v7  ;;  %v256_v9 = vld [vmem:[%s3660_s13 + $0x17c] sm:$0xf] }
  0x2a   :  { %255 = vst [vmem:[#allocation2 + $0x178] sm:$0xf] %v254_v8  ;;  %257 = vst [vmem:[#allocation2 + $0x17c] sm:$0xf] %v256_v9 }
  0x2b   :  { %480 = vsyncadd [#allocation4], 6144  ;;  %v3104_v10 = vld [vmem:[%s3658_s14] sm:$0xff]  ;;  %v3109_v11 = vld [vmem:[%s3658_s14 + $0x8] sm:$0xff]  ;;  %vm546_vm0 = vcmask 1040384   ;;  %vm567_vm1 = vcmask 1046528  }
  0x2c   :  { %v3114_v12 = vld [vmem:[%s3658_s14 + $0x10] sm:$0xff]  ;;  %v3119_v13 = vld [vmem:[%s3658_s14 + $0x18] sm:$0xff]  ;;  %v3124_v14 = vld [vmem:[%s3658_s14 + $0x20] sm:$0xff]  ;;  %vm590_vm2 = vcmask 1045504  }
  0x2d   :  { %v3129_v15 = vld [vmem:[%s3658_s14 + $0x28] sm:$0xff]  ;;  %v3134_v16 = vld [vmem:[%s3658_s14 + $0x30] sm:$0xff]  ;;  %v3139_v17 = vld [vmem:[%s3658_s14 + $0x38] sm:$0xff] }
  0x2e   :  { %v538_v18 = vld [vmem:[%s3645_s0] sm:$0xff]  ;;  %v539_v19 = vld [vmem:[%s3645_s0 + $0x8] sm:$0xff]  ;;  %v540_v22 = vld [vmem:[%s3645_s0 + $0x10] sm:$0xff] }
  0x2f   :  { %v547_v20 = vrot.slane %v538_v18, 7  ;;  %v548_v21 = vrot.slane %v539_v19, 7  ;;  %v541_v23 = vld [vmem:[%s3645_s0 + $0x18] sm:$0xff]  ;;  %v550_v24 = vrot.slane %v540_v22, 7 }
  0x30   :  { %v551_v25 = vrot.slane %v541_v23, 7 }
  0x31   :  { %537 = vsyncadd [#allocation4 + $0x1], 1024  ;;  %v549_v26 = vsel %vm546_vm0, %v547_v20, %v548_v21  ;;  %v559_v27 = vsel %vm546_vm0, 0.0, %v547_v20  ;;  %v561_v28 = vsel %vm546_vm0, %v548_v21, 0.0  ;;  %v2733_v29 = vld [vmem:[%s3646_s1 + $0x4] ss:$8 sps:$4 sm:$0xff]  }
  0x32   :  { %v2735_v30 = vld [vmem:[%s3646_s1] ss:$8 sps:$4 sm:$0xff]   ;;  %v568_v31 = vrot.slane %v559_v27, 1  ;;  %v569_v32 = vrot.slane %v549_v26, 1  ;;  %v571_v33 = vrot.slane %v561_v28, 1  ;;  %v594_v34 = vrot.slane %v561_v28, 2  ;;  %668 = vmatprep.subr.bf16.mxu0 %v2733_v29 }
  0x33   :  { %v591_v35 = vrot.slane %v559_v27, 2  ;;  %v592_v36 = vrot.slane %v549_v26, 2  ;;  %v552_v37 = vsel %vm546_vm0, %v550_v24, %v551_v25  ;;  %v560_v38 = vsel %vm546_vm0, 0.0, %v550_v24  ;;  %v2736_v39 = vld [vmem:[%s3646_s1 + $0x14] ss:$8 sps:$4 sm:$0xff]   ;;  %669 = vmatpush1.bf16.msra.mxu0 %v2735_v30  ;;  %s2790_s20 = smov 16  }
  0x34   :  { %v570_v40 = vsel %vm567_vm1, %v568_v31, %v569_v32  ;;  %v572_v41 = vsel %vm567_vm1, %v569_v32, %v571_v33  ;;  %v562_v42 = vsel %vm546_vm0, %v551_v25, 0.0  ;;  %v573_v43 = vrot.slane %v560_v38, 1  ;;  %v2738_v44 = vld [vmem:[%s3646_s1 + $0x10] ss:$8 sps:$4 sm:$0xff]   ;;  %670 = vmatprep.subr.bf16.mxu0 %v2736_v39  ;;  %v2739_v49 = vld [vmem:[%s3646_s1 + $0x24] ss:$8 sps:$4 sm:$0xff]  }
  0x35   :  { %v2713_v45 = vpack.i.bf16 %v572_v41, %v570_v40  ;;  %v593_v46 = vsel %vm590_vm2, %v591_v35, %v592_v36  ;;  %v595_v47 = vsel %vm590_vm2, %v592_v36, %v594_v34  ;;  %v574_v48 = vrot.slane %v552_v37, 1  ;;  %v2741_v57 = vld [vmem:[%s3646_s1 + $0x20] ss:$8 sps:$4 sm:$0xff]   ;;  %s2792_s23 = smov 32  }
  0x36   :  { %v576_v50 = vrot.slane %v562_v42, 1  ;;  %v599_v51 = vrot.slane %v562_v42, 2  ;;  %v596_v52 = vrot.slane %v560_v38, 2  ;;  %v2718_v53 = vpack.i.bf16 %v595_v47, %v593_v46 }
  0x37   :  { %2714 = vrot.lane.b32.xlu0 %v2713_v45, %s2790_s20  ;;  %v575_v54 = vsel %vm567_vm1, %v573_v43, %v574_v48  ;;  %v597_v55 = vrot.slane %v552_v37, 2  ;;  %671 = vmatpush1.bf16.msra.mxu0 %v2738_v44  ;;  %v2791_v58 = vmov 0   ;;  %vm613_vm3 = vcmask 130048  }
  0x38   :  { %v577_v56 = vsel %vm567_vm1, %v574_v48, %v576_v50  ;;  %700 = vmatprep.mubr.bf16.mxu0 %v2791_v58  ;;  %672 = vmatprep.subr.bf16.mxu0 %v2739_v49  ;;  %vm618_vm4 = vcmask 261120   ;;  %vm661_vm5 = vcmask 392192   ;;  %v2793_v29 = vmov 1983009808  }
  0x39   :  { %v2723_v59 = vpack.i.bf16 %v577_v56, %v575_v54  ;;  %v598_v60 = vsel %vm590_vm2, %v596_v52, %v597_v55  ;;  %v600_v61 = vsel %vm590_vm2, %v597_v55, %v599_v51  ;;  %v732_v30 = vunpack.c.l.s4 %v2793_v29 }
  0x3a   :  { %v2728_v62 = vpack.i.bf16 %v600_v61, %v598_v60  ;;  %v734_v31 = vlaneseq  ;;  %vm961_vm6 = vcmask 1041408   ;;  %vm1259_vm7 = vcmask 1042434  }
  0x3b   :  { %2719 = vrot.lane.b32.xlu0 %v2718_v53, %s2792_s23  ;;  %2724 = vrot.lane.b32.xlu1 %v2723_v59, %s2790_s20  ;;  %v733_v32 = vunpack.c.0.s8 %v732_v30  ;;  %vm1262_vm8 = vcmask 1043459   ;;  %vm1265_vm9 = vcmask 1044484   ;;  %vm1268_vm10 = vcmask 1045509  }
  0x3c   :  { %673 = vmatpush1.bf16.msra.mxu0 %v2741_v57  ;;  %v3198_v33 = vshrl.u32 %v734_v31, 7  ;;  %vm1271_vm11 = vcmask 1046534   ;;  %vm1274_vm12 = vcmask 1047559  }
  0x3e   :  { %v3201_v35 = vsub.s32 %v733_v32, %v3198_v33 }
  0x3f   :  { %2729 = vrot.lane.b32.xlu1 %v2728_v62, %s2792_s23 }
  0xa9   :  { %v2715_v63 = vpop.permute.xlu0 %2714 }
  0xaa   :  { %v2717_v0 = vunpack.i.h.bf16 %v2715_v63  ;;  %v2716_v1 = vunpack.i.l.bf16 %v2715_v63 }
  0xac   :  { %v615_v6 = vsel %vm613_vm3, %v549_v26, %v2717_v0  ;;  %v614_v7 = vsel %vm613_vm3, %v559_v27, %v2716_v1 }
  0xad   :  { %v2720_v2 = vpop.permute.xlu0 %2719  ;;  %v2725_v3 = vpop.permute.xlu1 %2724 }
  0xae   :  { %v2722_v4 = vunpack.i.h.bf16 %v2720_v2  ;;  %v2721_v5 = vunpack.i.l.bf16 %v2720_v2  ;;  %v2727_v8 = vunpack.i.h.bf16 %v2725_v3  ;;  %v2726_v9 = vunpack.i.l.bf16 %v2725_v3 }
  0xb0   :  { %v619_v18 = vsel %vm618_vm4, %v614_v7, %v2721_v5  ;;  %v620_v19 = vsel %vm618_vm4, %v615_v6, %v2722_v4  ;;  %v617_v24 = vsel %vm613_vm3, %v552_v37, %v2727_v8  ;;  %v616_v25 = vsel %vm613_vm3, %v560_v38, %v2726_v9 }
  0xb1   :  { %v623_v20 = vpack.c.bf16 %v620_v19, %v619_v18  ;;  %v2730_v21 = vpop.permute.xlu1 %2729 }
  0xb2   :  { %v2732_v22 = vunpack.i.h.bf16 %v2730_v21  ;;  %v2731_v23 = vunpack.i.l.bf16 %v2730_v21 }
  0xb3   :  { %2552 = vmatmul.mubr.msk.bf16.vlgmr.msra.gmra.mrb[0].mxu0 %vm661_vm5, %v623_v20 }
  0xb4   :  { %710 = vmatprep.mubr.bf16.mxu0 %v2791_v58  ;;  %v621_v26 = vsel %vm618_vm4, %v616_v25, %v2731_v23  ;;  %v622_v27 = vsel %vm618_vm4, %v617_v24, %v2732_v22 }
  0xb5   :  { %v624_v28 = vpack.c.bf16 %v622_v27, %v621_v26 }
  0xbb   :  { %2553 = vmatmul.mubr.msk.bf16.gmra.mrb[4].mxu0 %vm661_vm5, %v624_v28 }
 0x186   :  { %v702_v34 = vpop.f32.mrb[0].mxu0 }
 0x187   :  { %v704_v36 = vpop.f32.mrb[1].mxu0 }
 0x188   :  { %v729_v37 = vcombine.low %v702_v34, %v704_v36  ;;  %v730_v38 = vcombine.high %v702_v34, %v704_v36  ;;  %v706_v39 = vpop.f32.mrb[2].mxu0 }
 0x189   :  { %v708_v40 = vpop.f32.mrb[3].mxu0 }
 0x18a   :  { %v737_v41 = vrot.slane %v729_v37, %v3201_v35  ;;  %v744_v42 = vrot.slane %v730_v38, %v3201_v35  ;;  %v747_v43 = vcombine.low %v706_v39, %v708_v40  ;;  %v748_v44 = vcombine.high %v706_v39, %v708_v40 }
 0x18c   :  { %v745_v45 = vcombine.high %v737_v41, %v737_v41  ;;  %v746_v46 = vcombine.high %v744_v42, %v744_v42  ;;  %v807_v47 = vrot.slane %v737_v41, %v3201_v35  ;;  %v823_v48 = vrot.slane %v744_v42, %v3201_v35 }
 0x18d   :  { %v3208_v49 = vrot.slane %v747_v43, %v3201_v35  ;;  %v3211_v50 = vrot.slane %v748_v44, %v3201_v35 }
 0x18e   :  { %v808_v51 = vcombine.high %v807_v47, %v807_v47  ;;  %v815_v52 = vrot.slane %v745_v45, %v3201_v35  ;;  %v824_v53 = vcombine.high %v823_v48, %v823_v48  ;;  %v831_v54 = vrot.slane %v746_v46, %v3201_v35  ;;  %v3215_v55 = vpop.f32.mrb[4].mxu0 }
 0x18f   :  { %v962_v56 = vsel %vm961_vm6, %v807_v47, -inf  ;;  %v990_v57 = vsel %vm961_vm6, %v823_v48, -inf  ;;  %v763_v59 = vcombine.high %v3208_v49, %v3208_v49  ;;  %v764_v60 = vcombine.high %v3211_v50, %v3211_v50  ;;  %v3223_v61 = vpop.f32.mrb[5].mxu0 }
 0x190   :  { %v816_v62 = vcombine.high %v815_v52, %v815_v52  ;;  %v832_v63 = vcombine.high %v831_v54, %v831_v54  ;;  %v963_v0 = vrot.slane %v962_v56, 4  ;;  %v969_v1 = vsel %vm961_vm6, %v808_v51, -inf  ;;  %v3226_v2 = vpop.f32.mrb[6].mxu0 }
 0x191   :  { %v970_v3 = vrot.slane %v969_v1, 4  ;;  %v976_v4 = vsel %vm961_vm6, %v815_v52, -inf  ;;  %v991_v5 = vrot.slane %v990_v57, 4  ;;  %v997_v6 = vsel %vm961_vm6, %v824_v53, -inf  ;;  %v3230_v7 = vpop.f32.mrb[7].mxu0 }
 0x192   :  { %v964_v8 = vmax.f32 %v962_v56, %v963_v0  ;;  %v977_v9 = vrot.slane %v976_v4, 4  ;;  %v983_v18 = vsel %vm961_vm6, %v816_v62, -inf  ;;  %v998_v19 = vrot.slane %v997_v6, 4 }
 0x193   :  { %v971_v20 = vmax.f32 %v969_v1, %v970_v3  ;;  %v984_v21 = vrot.slane %v983_v18, 4  ;;  %v992_v22 = vmax.f32 %v990_v57, %v991_v5  ;;  %v1004_v23 = vsel %vm961_vm6, %v831_v54, -inf }
 0x194   :  { %v965_v24 = vrot.slane %v964_v8, 2  ;;  %v978_v25 = vmax.f32 %v976_v4, %v977_v9  ;;  %v999_v26 = vmax.f32 %v997_v6, %v998_v19  ;;  %v1005_v27 = vrot.slane %v1004_v23, 4  ;;  %v3238_v6 = vld [vmem:[%s3647_s2] ss:$0 sm:$0xff] }
 0x195   :  { %v972_v28 = vrot.slane %v971_v20, 2  ;;  %v985_v29 = vmax.f32 %v983_v18, %v984_v21  ;;  %v993_v30 = vrot.slane %v992_v22, 2  ;;  %v1011_v32 = vsel %vm961_vm6, %v832_v63, -inf }
 0x196   :  { %v966_v34 = vmax.f32 %v964_v8, %v965_v24  ;;  %v979_v36 = vrot.slane %v978_v25, 2  ;;  %v1000_v37 = vrot.slane %v999_v26, 2  ;;  %v1006_v38 = vmax.f32 %v1004_v23, %v1005_v27 }
 0x197   :  { %v973_v39 = vmax.f32 %v971_v20, %v972_v28  ;;  %v986_v40 = vrot.slane %v985_v29, 2  ;;  %v994_v41 = vmax.f32 %v992_v22, %v993_v30  ;;  %v1012_v42 = vrot.slane %v1011_v32, 4 }
 0x198   :  { %v967_v43 = vrot.slane %v966_v34, 1  ;;  %v980_v44 = vmax.f32 %v978_v25, %v979_v36  ;;  %v1001_v45 = vmax.f32 %v999_v26, %v1000_v37  ;;  %v1007_v46 = vrot.slane %v1006_v38, 2 }
 0x199   :  { %v974_v47 = vrot.slane %v973_v39, 1  ;;  %v987_v48 = vmax.f32 %v985_v29, %v986_v40  ;;  %v995_v51 = vrot.slane %v994_v41, 1  ;;  %v1013_v52 = vmax.f32 %v1011_v32, %v1012_v42 }
 0x19a   :  { %v968_v53 = vmax.f32 %v966_v34, %v967_v43  ;;  %v981_v54 = vrot.slane %v980_v44, 1  ;;  %v1002_v56 = vrot.slane %v1001_v45, 1  ;;  %v1008_v57 = vmax.f32 %v1006_v38, %v1007_v46 }
 0x19b   :  { %v975_v62 = vmax.f32 %v973_v39, %v974_v47  ;;  %v988_v63 = vrot.slane %v987_v48, 1  ;;  %v996_v0 = vmax.f32 %v994_v41, %v995_v51  ;;  %v1014_v1 = vrot.slane %v1013_v52, 2 }
 0x19c   :  { %v982_v3 = vmax.f32 %v980_v44, %v981_v54  ;;  %v1003_v4 = vmax.f32 %v1001_v45, %v1002_v56  ;;  %v1009_v5 = vrot.slane %v1008_v57, 1  ;;  %v839_v8 = vrot.slane %v3208_v49, %v3201_v35 }
 0x19d   :  { %v989_v9 = vmax.f32 %v987_v48, %v988_v63  ;;  %v1015_v18 = vmax.f32 %v1013_v52, %v1014_v1  ;;  %v1186_v19 = vmax.f32 %v968_v53, %v975_v62  ;;  %v847_v20 = vrot.slane %v763_v59, %v3201_v35 }
 0x19e   :  { %v1010_v21 = vmax.f32 %v1008_v57, %v1009_v5  ;;  %v1188_v22 = vmax.f32 %v996_v0, %v1003_v4  ;;  %v840_v23 = vcombine.high %v839_v8, %v839_v8  ;;  %v855_v24 = vrot.slane %v3211_v50, %v3201_v35 }
 0x19f   :  { %v1016_v25 = vrot.slane %v1015_v18, 1  ;;  %v1187_v26 = vmax.f32 %v982_v3, %v989_v9  ;;  %v1209_v27 = vadd.f32 %v3238_v6, %v1186_v19  ;;  %v848_v28 = vcombine.high %v847_v20, %v847_v20 }
 0x1a0   :  { %v1211_v29 = vadd.f32 %v3238_v6, %v1188_v22  ;;  %v856_v30 = vcombine.high %v855_v24, %v855_v24  ;;  %v863_v49 = vrot.slane %v764_v60, %v3201_v35  ;;  %v1018_v59 = vsel %vm961_vm6, %v839_v8, -inf }
 0x1a1   :  { %v1017_v32 = vmax.f32 %v1015_v18, %v1016_v25  ;;  %v1210_v34 = vadd.f32 %v3238_v6, %v1187_v26  ;;  %v1225_v36 = vmax.f32 %v1209_v27, 0.0  ;;  %v1019_v37 = vrot.slane %v1018_v59, 4 }
 0x1a2   :  { %v1227_v38 = vmax.f32 %v1211_v29, 0.0  ;;  %v864_v39 = vcombine.high %v863_v49, %v863_v49  ;;  %v1025_v40 = vsel %vm961_vm6, %v840_v23, -inf  ;;  %v1032_v41 = vsel %vm961_vm6, %v847_v20, -inf }
 0x1a3   :  { %v1189_v42 = vmax.f32 %v1010_v21, %v1017_v32  ;;  %v1226_v43 = vmax.f32 %v1210_v34, 0.0  ;;  %v1257_v44 = vrot.slane %v1225_v36, 7  ;;  %v1020_v45 = vmax.f32 %v1018_v59, %v1019_v37 }
 0x1a4   :  { %v1261_v46 = vrot.slane %v1227_v38, 5  ;;  %v1026_v50 = vrot.slane %v1025_v40, 4  ;;  %v1033_v60 = vrot.slane %v1032_v41, 4  ;;  %v1039_v47 = vsel %vm961_vm6, %v848_v28, -inf }
 0x1a5   :  { %v1212_v48 = vadd.f32 %v3238_v6, %v1189_v42  ;;  %v1258_v51 = vrot.slane %v1226_v43, 6  ;;  %v1021_v52 = vrot.slane %v1020_v45, 2  ;;  %v1040_v53 = vrot.slane %v1039_v47, 4 }
 0x1a6   :  { %v1027_v54 = vmax.f32 %v1025_v40, %v1026_v50  ;;  %v1034_v56 = vmax.f32 %v1032_v41, %v1033_v60  ;;  %v1046_v57 = vsel %vm961_vm6, %v855_v24, -inf  ;;  %v1053_v62 = vsel %vm961_vm6, %v856_v30, -inf }
 0x1a7   :  { %v1228_v63 = vmax.f32 %v1212_v48, 0.0  ;;  %v1260_v0 = vsel %vm1259_vm7, %v1258_v51, %v1257_v44  ;;  %v1022_v1 = vmax.f32 %v1020_v45, %v1021_v52  ;;  %v1041_v3 = vmax.f32 %v1039_v47, %v1040_v53 }
 0x1a8   :  { %v1263_v4 = vsel %vm1262_vm8, %v1261_v46, %v1260_v0  ;;  %v1028_v5 = vrot.slane %v1027_v54, 2  ;;  %v1035_v8 = vrot.slane %v1034_v56, 2  ;;  %v1047_v9 = vrot.slane %v1046_v57, 4 }
 0x1a9   :  { %v1264_v18 = vrot.slane %v1228_v63, 4  ;;  %v1023_v19 = vrot.slane %v1022_v1, 1  ;;  %v1042_v20 = vrot.slane %v1041_v3, 2  ;;  %v1054_v21 = vrot.slane %v1053_v62, 4 }
 0x1aa   :  { %v1029_v22 = vmax.f32 %v1027_v54, %v1028_v5  ;;  %v1036_v23 = vmax.f32 %v1034_v56, %v1035_v8  ;;  %v1048_v25 = vmax.f32 %v1046_v57, %v1047_v9  ;;  %v1060_v24 = vsel %vm961_vm6, %v863_v49, -inf }
 0x1ab   :  { %v1266_v26 = vsel %vm1265_vm9, %v1264_v18, %v1263_v4  ;;  %v1024_v27 = vmax.f32 %v1022_v1, %v1023_v19  ;;  %v1043_v28 = vmax.f32 %v1041_v3, %v1042_v20  ;;  %v1055_v29 = vmax.f32 %v1053_v62, %v1054_v21 }
 0x1ac   :  { %v1030_v30 = vrot.slane %v1029_v22, 1  ;;  %v1037_v59 = vrot.slane %v1036_v23, 1  ;;  %v1049_v32 = vrot.slane %v1048_v25, 2  ;;  %v1061_v34 = vrot.slane %v1060_v24, 4 }
 0x1ad   :  { %v1044_v36 = vrot.slane %v1043_v28, 1  ;;  %v1056_v37 = vrot.slane %v1055_v29, 2  ;;  %v1067_v38 = vsel %vm961_vm6, %v864_v39, -inf  ;;  %v765_v40 = vcombine.low %v3215_v55, %v3223_v61 }
 0x1ae   :  { %v1031_v41 = vmax.f32 %v1029_v22, %v1030_v30  ;;  %v1038_v42 = vmax.f32 %v1036_v23, %v1037_v59  ;;  %v1050_v49 = vmax.f32 %v1048_v25, %v1049_v32  ;;  %v1062_v43 = vmax.f32 %v1060_v24, %v1061_v34 }
 0x1af   :  { %v1045_v44 = vmax.f32 %v1043_v28, %v1044_v36  ;;  %v1057_v45 = vmax.f32 %v1055_v29, %v1056_v37  ;;  %v1068_v46 = vrot.slane %v1067_v38, 4  ;;  %v766_v50 = vcombine.high %v3215_v55, %v3223_v61 }
 0x1b0   :  { %v1051_v60 = vrot.slane %v1050_v49, 1  ;;  %v1063_v47 = vrot.slane %v1062_v43, 2  ;;  %v1190_v48 = vmax.f32 %v1024_v27, %v1031_v41  ;;  %v773_v39 = vrot.slane %v765_v40, %v3201_v35 }
 0x1b1   :  { %v1058_v51 = vrot.slane %v1057_v45, 1  ;;  %v1069_v52 = vmax.f32 %v1067_v38, %v1068_v46  ;;  %v1191_v53 = vmax.f32 %v1038_v42, %v1045_v44  ;;  %v780_v54 = vrot.slane %v766_v50, %v3201_v35 }
 0x1b2   :  { %v1052_v56 = vmax.f32 %v1050_v49, %v1051_v60  ;;  %v1064_v57 = vmax.f32 %v1062_v43, %v1063_v47  ;;  %v1213_v62 = vadd.f32 %v3238_v6, %v1190_v48  ;;  %v781_v63 = vcombine.high %v773_v39, %v773_v39 }
 0x1b3   :  { %v1059_v0 = vmax.f32 %v1057_v45, %v1058_v51  ;;  %v1070_v1 = vrot.slane %v1069_v52, 2  ;;  %v1214_v55 = vadd.f32 %v3238_v6, %v1191_v53  ;;  %v782_v61 = vcombine.high %v780_v54, %v780_v54 }
 0x1b4   :  { %v1065_v3 = vrot.slane %v1064_v57, 1  ;;  %v1229_v4 = vmax.f32 %v1213_v62, 0.0  ;;  %v871_v5 = vrot.slane %v773_v39, %v3201_v35  ;;  %v879_v8 = vrot.slane %v781_v63, %v3201_v35 }
 0x1b5   :  { %v1071_v9 = vmax.f32 %v1069_v52, %v1070_v1  ;;  %v1192_v18 = vmax.f32 %v1052_v56, %v1059_v0  ;;  %v1230_v19 = vmax.f32 %v1214_v55, 0.0  ;;  %v887_v20 = vrot.slane %v780_v54, %v3201_v35 }
 0x1b6   :  { %v1066_v21 = vmax.f32 %v1064_v57, %v1065_v3  ;;  %v1267_v22 = vrot.slane %v1229_v4, 3  ;;  %v872_v23 = vcombine.high %v871_v5, %v871_v5  ;;  %v880_v25 = vcombine.high %v879_v8, %v879_v8 }
 0x1b7   :  { %v1072_v24 = vrot.slane %v1071_v9, 1  ;;  %v1215_v27 = vadd.f32 %v3238_v6, %v1192_v18  ;;  %v1270_v28 = vrot.slane %v1230_v19, 2  ;;  %v888_v29 = vcombine.high %v887_v20, %v887_v20 }
 0x1b8   :  { %v1269_v30 = vsel %vm1268_vm10, %v1267_v22, %v1266_v26  ;;  %v895_v59 = vrot.slane %v782_v61, %v3201_v35  ;;  %v1074_v32 = vsel %vm961_vm6, %v871_v5, -inf  ;;  %v1081_v34 = vsel %vm961_vm6, %v872_v23, -inf }
 0x1b9   :  { %v1073_v36 = vmax.f32 %v1071_v9, %v1072_v24  ;;  %v1231_v37 = vmax.f32 %v1215_v27, 0.0  ;;  %v1272_v38 = vsel %vm1271_vm11, %v1270_v28, %v1269_v30  ;;  %v1075_v40 = vrot.slane %v1074_v32, 4 }
 0x1ba   :  { %v896_v41 = vcombine.high %v895_v59, %v895_v59  ;;  %v1082_v42 = vrot.slane %v1081_v34, 4  ;;  %v1088_v49 = vsel %vm961_vm6, %v879_v8, -inf  ;;  %v1095_v43 = vsel %vm961_vm6, %v880_v25, -inf }
 0x1bb   :  { %v1193_v44 = vmax.f32 %v1066_v21, %v1073_v36  ;;  %v1273_v45 = vrot.slane %v1231_v37, 1  ;;  %v1076_v26 = vmax.f32 %v1074_v32, %v1075_v40  ;;  %v1089_v46 = vrot.slane %v1088_v49, 4 }
 0x1bc   :  { %v1083_v50 = vmax.f32 %v1081_v34, %v1082_v42  ;;  %v1096_v60 = vrot.slane %v1095_v43, 4  ;;  %v1102_v47 = vsel %vm961_vm6, %v887_v20, -inf  ;;  %v1109_v48 = vsel %vm961_vm6, %v888_v29, -inf }
 0x1bd   :  { %v1216_v39 = vadd.f32 %v3238_v6, %v1193_v44  ;;  %v3290_v51 = vsel %vm1274_vm12, %v1273_v45, %v1272_v38  ;;  %v1077_v52 = vrot.slane %v1076_v26, 2  ;;  %v1090_v53 = vmax.f32 %v1088_v49, %v1089_v46 }
 0x1be   :  { %v1293_v54 = vsel %vm546_vm0, 0.0, %v3290_v51  ;;  %v1084_v56 = vrot.slane %v1083_v50, 2  ;;  %v1097_v57 = vmax.f32 %v1095_v43, %v1096_v60  ;;  %v1103_v62 = vrot.slane %v1102_v47, 4 }
 0x1bf   :  { %v1232_v63 = vmax.f32 %v1216_v39, 0.0  ;;  %v1301_v0 = vrot.slane %v1293_v54, 1  ;;  %v1309_v1 = vrot.slane %v1293_v54, 2  ;;  %v1078_v55 = vmax.f32 %v1076_v26, %v1077_v52 }
 0x1c0   :  { %v1085_v61 = vmax.f32 %v1083_v50, %v1084_v56  ;;  %v1091_v3 = vrot.slane %v1090_v53, 2  ;;  %v1098_v4 = vrot.slane %v1097_v57, 2  ;;  %v1104_v5 = vmax.f32 %v1102_v47, %v1103_v62 }
 0x1c1   :  { %v1295_v8 = vsel %vm546_vm0, %v1232_v63, 0.0  ;;  %v1079_v9 = vrot.slane %v1078_v55, 1  ;;  %v1110_v18 = vrot.slane %v1109_v48, 4  ;;  %v1116_v19 = vsel %vm961_vm6, %v895_v59, -inf }
 0x1c2   :  { %v1302_v20 = vrot.slane %v1295_v8, 1  ;;  %v1310_v21 = vrot.slane %v1295_v8, 2  ;;  %v1086_v22 = vrot.slane %v1085_v61, 1  ;;  %v1092_v23 = vmax.f32 %v1090_v53, %v1091_v3 }
 0x1c3   :  { %v1080_v25 = vmax.f32 %v1078_v55, %v1079_v9  ;;  %v1099_v24 = vmax.f32 %v1097_v57, %v1098_v4  ;;  %v1105_v27 = vrot.slane %v1104_v5, 2  ;;  %v1111_v28 = vmax.f32 %v1109_v48, %v1110_v18 }
 0x1c4   :  { %v3297_v29 = vsel %vm567_vm1, %v1301_v0, %v1302_v20  ;;  %v3300_v30 = vsel %vm590_vm2, %v1309_v1, %v1310_v21  ;;  %v1087_v32 = vmax.f32 %v1085_v61, %v1086_v22  ;;  %v1093_v34 = vrot.slane %v1092_v23, 1 }
 0x1c5   :  { %v1100_v36 = vrot.slane %v1099_v24, 1  ;;  %v1106_v37 = vmax.f32 %v1104_v5, %v1105_v27  ;;  %v1112_v38 = vrot.slane %v1111_v28, 2  ;;  %v1117_v59 = vrot.slane %v1116_v19, 4 }
 0x1c6   :  { %v1094_v40 = vmax.f32 %v1092_v23, %v1093_v34  ;;  %v1123_v42 = vsel %vm961_vm6, %v896_v41, -inf  ;;  %v1194_v49 = vmax.f32 %v1080_v25, %v1087_v32  ;;  %v783_v43 = vcombine.low %v3226_v2, %v3230_v7 }
 0x1c7   :  { %v1101_v44 = vmax.f32 %v1099_v24, %v1100_v36  ;;  %v1107_v45 = vrot.slane %v1106_v37, 1  ;;  %v1113_v26 = vmax.f32 %v1111_v28, %v1112_v38  ;;  %v1118_v46 = vmax.f32 %v1116_v19, %v1117_v59 }
 0x1c8   :  { %v1124_v50 = vrot.slane %v1123_v42, 4  ;;  %v1217_v60 = vadd.f32 %v3238_v6, %v1194_v49  ;;  %v784_v47 = vcombine.high %v3226_v2, %v3230_v7  ;;  %v791_v48 = vrot.slane %v783_v43, %v3201_v35 }
 0x1c9   :  { %v1108_v39 = vmax.f32 %v1106_v37, %v1107_v45  ;;  %v1114_v52 = vrot.slane %v1113_v26, 1  ;;  %v1119_v53 = vrot.slane %v1118_v46, 2  ;;  %v1195_v41 = vmax.f32 %v1094_v40, %v1101_v44 }
 0x1ca   :  { %v1125_v54 = vmax.f32 %v1123_v42, %v1124_v50  ;;  %v1233_v56 = vmax.f32 %v1217_v60, 0.0  ;;  %v798_v57 = vrot.slane %v784_v47, %v3201_v35  ;;  %v799_v62 = vcombine.high %v791_v48, %v791_v48 }
 0x1cb   :  { %v1115_v63 = vmax.f32 %v1113_v26, %v1114_v52  ;;  %v1120_v0 = vmax.f32 %v1118_v46, %v1119_v53  ;;  %v1218_v1 = vadd.f32 %v3238_v6, %v1195_v41  ;;  %v903_v55 = vrot.slane %v791_v48, %v3201_v35 }
 0x1cc   :  { %v1126_v61 = vrot.slane %v1125_v54, 2  ;;  %v1276_v3 = vrot.slane %v1233_v56, 7  ;;  %v800_v2 = vcombine.high %v798_v57, %v798_v57  ;;  %v911_v7 = vrot.slane %v799_v62, %v3201_v35 }
 0x1cd   :  { %v1121_v4 = vrot.slane %v1120_v0, 1  ;;  %v1196_v5 = vmax.f32 %v1108_v39, %v1115_v63  ;;  %v1234_v8 = vmax.f32 %v1218_v1, 0.0  ;;  %v904_v9 = vcombine.high %v903_v55, %v903_v55 }
 0x1ce   :  { %v1127_v18 = vmax.f32 %v1125_v54, %v1126_v61  ;;  %v912_v19 = vcombine.high %v911_v7, %v911_v7  ;;  %v919_v20 = vrot.slane %v798_v57, %v3201_v35  ;;  %v927_v21 = vrot.slane %v800_v2, %v3201_v35 }
 0x1cf   :  { %v1122_v22 = vmax.f32 %v1120_v0, %v1121_v4  ;;  %v1219_v23 = vadd.f32 %v3238_v6, %v1196_v5  ;;  %v1277_v25 = vrot.slane %v1234_v8, 6  ;;  %v1130_v24 = vsel %vm961_vm6, %v903_v55, -inf }
 0x1d0   :  { %v1128_v27 = vrot.slane %v1127_v18, 1  ;;  %v920_v28 = vcombine.high %v919_v20, %v919_v20  ;;  %v928_v32 = vcombine.high %v927_v21, %v927_v21  ;;  %v1131_v34 = vrot.slane %v1130_v24, 4 }
 0x1d1   :  { %v1235_v36 = vmax.f32 %v1219_v23, 0.0  ;;  %v1278_v37 = vsel %vm1259_vm7, %v1277_v25, %v1276_v3  ;;  %v1137_v38 = vsel %vm961_vm6, %v904_v9, -inf  ;;  %v1144_v59 = vsel %vm961_vm6, %v911_v7, -inf }
 0x1d2   :  { %v1129_v40 = vmax.f32 %v1127_v18, %v1128_v27  ;;  %v1132_v42 = vmax.f32 %v1130_v24, %v1131_v34  ;;  %v1138_v49 = vrot.slane %v1137_v38, 4  ;;  %v1145_v43 = vrot.slane %v1144_v59, 4 }
 0x1d3   :  { %v1279_v44 = vrot.slane %v1235_v36, 5  ;;  %v1151_v45 = vsel %vm961_vm6, %v912_v19, -inf  ;;  %v1158_v26 = vsel %vm961_vm6, %v919_v20, -inf  ;;  %v1165_v46 = vsel %vm961_vm6, %v920_v28, -inf }
 0x1d4   :  { %v1197_v50 = vmax.f32 %v1122_v22, %v1129_v40  ;;  %v1133_v60 = vrot.slane %v1132_v42, 2  ;;  %v1139_v47 = vmax.f32 %v1137_v38, %v1138_v49  ;;  %v1146_v48 = vmax.f32 %v1144_v59, %v1145_v43 }
 0x1d5   :  { %v1280_v39 = vsel %vm1262_vm8, %v1279_v44, %v1278_v37  ;;  %v1152_v52 = vrot.slane %v1151_v45, 4  ;;  %v1159_v53 = vrot.slane %v1158_v26, 4  ;;  %v1166_v41 = vrot.slane %v1165_v46, 4 }
 0x1d6   :  { %v1220_v54 = vadd.f32 %v3238_v6, %v1197_v50  ;;  %v1134_v56 = vmax.f32 %v1132_v42, %v1133_v60  ;;  %v1140_v57 = vrot.slane %v1139_v47, 2  ;;  %v1147_v62 = vrot.slane %v1146_v48, 2 }
 0x1d7   :  { %v1153_v63 = vmax.f32 %v1151_v45, %v1152_v52  ;;  %v1160_v0 = vmax.f32 %v1158_v26, %v1159_v53  ;;  %v1167_v1 = vmax.f32 %v1165_v46, %v1166_v41  ;;  %v1172_v55 = vsel %vm961_vm6, %v927_v21, -inf }
 0x1d8   :  { %v1236_v61 = vmax.f32 %v1220_v54, 0.0  ;;  %v1135_v3 = vrot.slane %v1134_v56, 1  ;;  %v1141_v2 = vmax.f32 %v1139_v47, %v1140_v57  ;;  %v1148_v7 = vmax.f32 %v1146_v48, %v1147_v62 }
 0x1d9   :  { %v1154_v4 = vrot.slane %v1153_v63, 2  ;;  %v1161_v5 = vrot.slane %v1160_v0, 2  ;;  %v1168_v8 = vrot.slane %v1167_v1, 2  ;;  %v1173_v9 = vrot.slane %v1172_v55, 4 }
 0x1da   :  { %v1281_v18 = vrot.slane %v1236_v61, 4  ;;  %v1142_v19 = vrot.slane %v1141_v2, 1  ;;  %v1149_v20 = vrot.slane %v1148_v7, 1  ;;  %v1136_v27 = vmax.f32 %v1134_v56, %v1135_v3 }
 0x1db   :  { %v1155_v22 = vmax.f32 %v1153_v63, %v1154_v4  ;;  %v1162_v23 = vmax.f32 %v1160_v0, %v1161_v5  ;;  %v1169_v25 = vmax.f32 %v1167_v1, %v1168_v8  ;;  %v1174_v24 = vmax.f32 %v1172_v55, %v1173_v9 }
 0x1dc   :  { %v1143_v28 = vmax.f32 %v1141_v2, %v1142_v19  ;;  %v1179_v34 = vsel %vm961_vm6, %v928_v32, -inf  ;;  %v1282_v21 = vsel %vm1265_vm9, %v1281_v18, %v1280_v39  ;;  %v1150_v49 = vmax.f32 %v1148_v7, %v1149_v20 }
 0x1dd   :  { %v1156_v36 = vrot.slane %v1155_v22, 1  ;;  %v1163_v37 = vrot.slane %v1162_v23, 1  ;;  %v1170_v38 = vrot.slane %v1169_v25, 1  ;;  %v1175_v59 = vrot.slane %v1174_v24, 2 }
 0x1de   :  { %v1180_v40 = vrot.slane %v1179_v34, 4  ;;  %v1198_v42 = vmax.f32 %v1136_v27, %v1143_v28 }
 0x1df   :  { %v1157_v43 = vmax.f32 %v1155_v22, %v1156_v36  ;;  %v1164_v44 = vmax.f32 %v1162_v23, %v1163_v37  ;;  %v1171_v45 = vmax.f32 %v1169_v25, %v1170_v38  ;;  %v1176_v26 = vmax.f32 %v1174_v24, %v1175_v59 }
 0x1e0   :  { %v1181_v46 = vmax.f32 %v1179_v34, %v1180_v40  ;;  %v1221_v50 = vadd.f32 %v3238_v6, %v1198_v42 }
 0x1e1   :  { %v1199_v60 = vmax.f32 %v1150_v49, %v1157_v43  ;;  %v1200_v47 = vmax.f32 %v1164_v44, %v1171_v45  ;;  %v1177_v53 = vrot.slane %v1176_v26, 1 }
 0x1e2   :  { %v1182_v48 = vrot.slane %v1181_v46, 2  ;;  %v1237_v32 = vmax.f32 %v1221_v50, 0.0 }
 0x1e3   :  { %v1222_v39 = vadd.f32 %v3238_v6, %v1199_v60  ;;  %v1223_v52 = vadd.f32 %v3238_v6, %v1200_v47  ;;  %v1178_v1 = vmax.f32 %v1176_v26, %v1177_v53 }
 0x1e4   :  { %v1183_v41 = vmax.f32 %v1181_v46, %v1182_v48  ;;  %v1283_v54 = vrot.slane %v1237_v32, 3 }
 0x1e5   :  { %v1238_v56 = vmax.f32 %v1222_v39, 0.0  ;;  %v1239_v57 = vmax.f32 %v1223_v52, 0.0 }
 0x1e6   :  { %v1184_v62 = vrot.slane %v1183_v41, 1  ;;  %v1284_v63 = vsel %vm1268_vm10, %v1283_v54, %v1282_v21 }
 0x1e7   :  { %v1285_v0 = vrot.slane %v1238_v56, 2  ;;  %v1287_v61 = vrot.slane %v1239_v57, 1 }
 0x1e8   :  { %v1185_v55 = vmax.f32 %v1183_v41, %v1184_v62 }
 0x1e9   :  { %v1286_v3 = vsel %vm1271_vm11, %v1285_v0, %v1284_v63 }
 0x1ea   :  { %v1201_v2 = vmax.f32 %v1178_v1, %v1185_v55  ;;  %v3334_v7 = vsel %vm1274_vm12, %v1287_v61, %v1286_v3 }
 0x1eb   :  { %v1294_v5 = vsel %vm546_vm0, 0.0, %v3334_v7 }
 0x1ec   :  { %v1224_v4 = vadd.f32 %v3238_v6, %v1201_v2  ;;  %v1304_v9 = vrot.slane %v1294_v5, 1  ;;  %v1312_v18 = vrot.slane %v1294_v5, 2 }
 0x1ee   :  { %v1240_v8 = vmax.f32 %v1224_v4, 0.0 }
 0x1f0   :  { %v1296_v19 = vsel %vm546_vm0, %v1240_v8, 0.0 }
 0x1f1   :  { %v1305_v20 = vrot.slane %v1296_v19, 1  ;;  %v1313_v22 = vrot.slane %v1296_v19, 2 }
 0x1f3   :  { %v1306_v23 = vsel %vm567_vm1, %v1304_v9, %v1305_v20  ;;  %v3342_v25 = vsel %vm590_vm2, %v1312_v18, %v1313_v22 }
 0x1f4   :  { %v1318_v24 = vpack.c.bf16 %v1306_v23, %v3297_v29  ;;  %v1319_v6 = vpack.c.bf16 %v3342_v25, %v3300_v30 }
 0x1f5   :  { %2786 = dma.done.wait [#allocation4], 6144 }
 0x1f6   :  { %2787 = vsyncadd [#allocation4], 4294961152  ;;  %1404 = vmatprep.mubr.bf16.mxu1 %v1318_v24  ;;  %v1325_v27 = vld [vmem:[#allocation2 + $0x8] sm:$0xff]  ;;  %v1324_v28 = vld [vmem:[#allocation2] sm:$0xff]  ;;  %v2558_v55 = vpack.c.bf16 %v3334_v7, %v3290_v51 }
 0x1f7   :  { %v1327_v34 = vld [vmem:[#allocation2 + $0x18] sm:$0xff]  ;;  %1372 = vmatprep.subr.bf16.mxu1 %v1325_v27  ;;  %v1326_v21 = vld [vmem:[#allocation2 + $0x10] sm:$0xff]  ;;  %v1329_v36 = vld [vmem:[#allocation2 + $0x28] sm:$0xff] }
 0x1f8   :  { %1373 = vmatpush1.bf16.msra.mxu1 %v1324_v28  ;;  %v1328_v37 = vld [vmem:[#allocation2 + $0x20] sm:$0xff]  ;;  %v1331_v38 = vld [vmem:[#allocation2 + $0x38] sm:$0xff]  ;;  %v1330_v29 = vld [vmem:[#allocation2 + $0x30] sm:$0xff] }
 0x1f9   :  { %1374 = vmatprep.subr.bf16.mxu1 %v1327_v34  ;;  %v1333_v59 = vld [vmem:[#allocation2 + $0x48] sm:$0xff]  ;;  %v1332_v40 = vld [vmem:[#allocation2 + $0x40] sm:$0xff]  ;;  %v1335_v42 = vld [vmem:[#allocation2 + $0x58] sm:$0xff] }
 0x1fa   :  { %v1334_v49 = vld [vmem:[#allocation2 + $0x50] sm:$0xff]  ;;  %v1337_v43 = vld [vmem:[#allocation2 + $0x68] sm:$0xff]  ;;  %v1336_v44 = vld [vmem:[#allocation2 + $0x60] sm:$0xff] }
 0x1fb   :  { %v1339_v45 = vld [vmem:[#allocation2 + $0x78] sm:$0xff]  ;;  %v1338_v26 = vld [vmem:[#allocation2 + $0x70] sm:$0xff]  ;;  %v1341_v46 = vld [vmem:[#allocation2 + $0x88] sm:$0xff] }
 0x1fc   :  { %1375 = vmatpush1.bf16.msra.mxu1 %v1326_v21  ;;  %v1340_v50 = vld [vmem:[#allocation2 + $0x80] sm:$0xff]  ;;  %v1343_v60 = vld [vmem:[#allocation2 + $0x98] sm:$0xff]  ;;  %v1342_v47 = vld [vmem:[#allocation2 + $0x90] sm:$0xff] }
 0x1fd   :  { %1376 = vmatprep.subr.bf16.mxu1 %v1329_v36  ;;  %v1345_v48 = vld [vmem:[#allocation2 + $0xa8] sm:$0xff]  ;;  %v1344_v32 = vld [vmem:[#allocation2 + $0xa0] sm:$0xff]  ;;  %v1347_v39 = vld [vmem:[#allocation2 + $0xb8] sm:$0xff] }
 0x1fe   :  { %v1346_v52 = vld [vmem:[#allocation2 + $0xb0] sm:$0xff]  ;;  %v1349_v53 = vld [vmem:[#allocation2 + $0xc8] sm:$0xff]  ;;  %v1348_v41 = vld [vmem:[#allocation2 + $0xc0] sm:$0xff] }
 0x1ff   :  { %v1351_v54 = vld [vmem:[#allocation2 + $0xd8] sm:$0xff]  ;;  %v1350_v56 = vld [vmem:[#allocation2 + $0xd0] sm:$0xff]  ;;  %v1353_v57 = vld [vmem:[#allocation2 + $0xe8] sm:$0xff] }
 0x200   :  { %1377 = vmatpush1.bf16.msra.mxu1 %v1328_v37  ;;  %v1352_v62 = vld [vmem:[#allocation2 + $0xe0] sm:$0xff]  ;;  %v1355_v63 = vld [vmem:[#allocation2 + $0xf8] sm:$0xff]  ;;  %v1354_v0 = vld [vmem:[#allocation2 + $0xf0] sm:$0xff] }
 0x201   :  { %1378 = vmatprep.subr.bf16.mxu1 %v1331_v38  ;;  %vm2555_vm13 = vmneg %vm546_vm0  ;;  %v1357_v1 = vld [vmem:[#allocation2 + $0x108] sm:$0xff]  ;;  %v1356_v61 = vld [vmem:[#allocation2 + $0x100] sm:$0xff] }
 0x202   :  { %vm2557_vm14 = vmpackc.low %vm2555_vm13, %vm2555_vm13  ;;  %v1359_v3 = vld [vmem:[#allocation2 + $0x118] sm:$0xff]  ;;  %v1358_v2 = vld [vmem:[#allocation2 + $0x110] sm:$0xff] }
 0x203   :  { %v1361_v4 = vld [vmem:[#allocation2 + $0x128] sm:$0xff]  ;;  %v1360_v5 = vld [vmem:[#allocation2 + $0x120] sm:$0xff]  ;;  %v1363_v8 = vld [vmem:[#allocation2 + $0x138] sm:$0xff] }
 0x204   :  { %1379 = vmatpush1.bf16.msra.mxu1 %v1330_v29  ;;  %v1362_v9 = vld [vmem:[#allocation2 + $0x130] sm:$0xff]  ;;  %v1365_v51 = vld [vmem:[#allocation2 + $0x148] sm:$0xff]  ;;  %v1364_v7 = vld [vmem:[#allocation2 + $0x140] sm:$0xff] }
 0x205   :  { %1380 = vmatprep.subr.bf16.mxu1 %v1333_v59  ;;  %v1367_v18 = vld [vmem:[#allocation2 + $0x158] sm:$0xff]  ;;  %v1366_v19 = vld [vmem:[#allocation2 + $0x150] sm:$0xff]  ;;  %v1369_v20 = vld [vmem:[#allocation2 + $0x168] sm:$0xff] }
 0x206   :  { %v1371_v22 = vld [vmem:[#allocation2 + $0x178] sm:$0xff]  ;;  %v1370_v23 = vld [vmem:[#allocation2 + $0x170] sm:$0xff] }
 0x208   :  { %1381 = vmatpush1.bf16.msra.mxu1 %v1332_v40 }
 0x209   :  { %1382 = vmatprep.subr.bf16.mxu1 %v1335_v42 }
 0x20c   :  { %1383 = vmatpush1.bf16.msra.mxu1 %v1334_v49 }
 0x20d   :  { %1384 = vmatprep.subr.bf16.mxu1 %v1337_v43 }
 0x210   :  { %1385 = vmatpush1.bf16.msra.mxu1 %v1336_v44 }
 0x211   :  { %1386 = vmatprep.subr.bf16.mxu1 %v1339_v45 }
 0x214   :  { %1387 = vmatpush1.bf16.msra.mxu1 %v1338_v26 }
 0x215   :  { %1388 = vmatprep.subr.bf16.mxu1 %v1341_v46 }
 0x218   :  { %1389 = vmatpush1.bf16.msra.mxu1 %v1340_v50 }
 0x219   :  { %1390 = vmatprep.subr.bf16.mxu1 %v1343_v60 }
 0x21c   :  { %1391 = vmatpush1.bf16.msra.mxu1 %v1342_v47 }
 0x21d   :  { %1392 = vmatprep.subr.bf16.mxu1 %v1345_v48 }
 0x220   :  { %1393 = vmatpush1.bf16.msra.mxu1 %v1344_v32 }
 0x221   :  { %1394 = vmatprep.subr.bf16.mxu1 %v1347_v39 }
 0x224   :  { %1395 = vmatpush1.bf16.msra.mxu1 %v1346_v52 }
 0x225   :  { %1396 = vmatprep.subr.bf16.mxu1 %v1349_v53 }
 0x228   :  { %1397 = vmatpush1.bf16.msra.mxu1 %v1348_v41 }
 0x229   :  { %1398 = vmatprep.subr.bf16.mxu1 %v1351_v54 }
 0x22c   :  { %1399 = vmatpush1.bf16.msra.mxu1 %v1350_v56 }
 0x22d   :  { %1400 = vmatprep.subr.bf16.mxu1 %v1353_v57 }
 0x230   :  { %1401 = vmatpush1.bf16.msra.mxu1 %v1352_v62 }
 0x231   :  { %1402 = vmatprep.subr.bf16.mxu1 %v1355_v63 }
 0x234   :  { %1403 = vmatpush1.bf16.msra.mxu1 %v1354_v0 }
 0x235   :  { %1415 = vmatprep.subr.bf16.mxu1 %v1357_v1 }
 0x237   :  { %2559 = vmatmul.mubr.msk.bf16.vlgmr.msra.gmra.mrb[0].mxu1 %vm2557_vm14, %v2558_v55 }
 0x238   :  { %1416 = vmatpush1.bf16.msra.mxu1 %v1356_v61  ;;  %1447 = vmatprep.mubr.bf16.mxu1 %v2791_v58  ;;  %v1368_v58 = vld [vmem:[#allocation2 + $0x160] sm:$0xff] }
 0x239   :  { %1417 = vmatprep.subr.bf16.mxu1 %v1359_v3 }
 0x23c   :  { %1418 = vmatpush1.bf16.msra.mxu1 %v1358_v2 }
 0x23d   :  { %1419 = vmatprep.subr.bf16.mxu1 %v1361_v4 }
 0x240   :  { %1420 = vmatpush1.bf16.msra.mxu1 %v1360_v5 }
 0x241   :  { %1421 = vmatprep.subr.bf16.mxu1 %v1363_v8 }
 0x244   :  { %1422 = vmatpush1.bf16.msra.mxu1 %v1362_v9 }
 0x245   :  { %1423 = vmatprep.subr.bf16.mxu1 %v1365_v51 }
 0x248   :  { %1424 = vmatpush1.bf16.msra.mxu1 %v1364_v7 }
 0x249   :  { %1425 = vmatprep.subr.bf16.mxu1 %v1367_v18 }
 0x24c   :  { %1426 = vmatpush1.bf16.msra.mxu1 %v1366_v19 }
 0x24d   :  { %1427 = vmatprep.subr.bf16.mxu1 %v1369_v20 }
 0x250   :  { %1428 = vmatpush1.bf16.msra.mxu1 %v1368_v58 }
 0x251   :  { %1429 = vmatprep.subr.bf16.mxu1 %v1371_v22 }
 0x254   :  { %1430 = vmatpush1.bf16.msra.mxu1 %v1370_v23 }
 0x257   :  { %1448 = vmatmul.mubr.bf16.vlgmr.msra.gmra.mrb[0].mxu1 %v1319_v6 }
 0x32a   :  { %v1449_v24 = vpop.f32.mrb[0].mxu1 }
 0x32b   :  { %v1451_v27 = vpop.f32.mrb[1].mxu1 }
 0x32c   :  { %v1462_v28 = vcombine.low %v1449_v24, %v1451_v27  ;;  %v1463_v34 = vcombine.high %v1449_v24, %v1451_v27  ;;  %v1453_v21 = vpop.f32.mrb[2].mxu1 }
 0x32d   :  { %v1455_v36 = vpop.f32.mrb[3].mxu1 }
 0x32e   :  { %v1470_v37 = vrot.slane %v1462_v28, %v3201_v35  ;;  %v1477_v38 = vrot.slane %v1463_v34, %v3201_v35  ;;  %v1480_v29 = vcombine.low %v1453_v21, %v1455_v36  ;;  %v1481_v59 = vcombine.high %v1453_v21, %v1455_v36 }
 0x330   :  { %v1478_v40 = vcombine.high %v1470_v37, %v1470_v37  ;;  %v1479_v42 = vcombine.high %v1477_v38, %v1477_v38  ;;  %v1504_v49 = vrot.slane %v1470_v37, %v3201_v35  ;;  %v1520_v43 = vrot.slane %v1477_v38, %v3201_v35 }
 0x331   :  { %v3359_v30 = vrot.slane %v1480_v29, %v3201_v35  ;;  %v3362_v25 = vrot.slane %v1481_v59, %v3201_v35 }
 0x332   :  { %v1505_v6 = vcombine.high %v1504_v49, %v1504_v49  ;;  %v1512_v44 = vrot.slane %v1478_v40, %v3201_v35  ;;  %v1521_v45 = vcombine.high %v1520_v43, %v1520_v43  ;;  %v1528_v26 = vrot.slane %v1479_v42, %v3201_v35 }
 0x333   :  { %v1578_v46 = vsel %vm961_vm6, %v1504_v49, -inf  ;;  %v1606_v50 = vsel %vm961_vm6, %v1520_v43, -inf  ;;  %v1496_v60 = vcombine.high %v3359_v30, %v3359_v30  ;;  %v1497_v47 = vcombine.high %v3362_v25, %v3362_v25 }
 0x334   :  { %v1513_v48 = vcombine.high %v1512_v44, %v1512_v44  ;;  %v1529_v32 = vcombine.high %v1528_v26, %v1528_v26  ;;  %v1579_v39 = vrot.slane %v1578_v46, 4  ;;  %v1585_v52 = vsel %vm961_vm6, %v1505_v6, -inf }
 0x335   :  { %v1586_v53 = vrot.slane %v1585_v52, 4  ;;  %v1592_v41 = vsel %vm961_vm6, %v1512_v44, -inf  ;;  %v1607_v54 = vrot.slane %v1606_v50, 4  ;;  %v1613_v56 = vsel %vm961_vm6, %v1521_v45, -inf }
 0x336   :  { %v1580_v57 = vmax.f32 %v1578_v46, %v1579_v39  ;;  %v1593_v62 = vrot.slane %v1592_v41, 4  ;;  %v1599_v63 = vsel %vm961_vm6, %v1513_v48, -inf  ;;  %v1614_v0 = vrot.slane %v1613_v56, 4  ;;  %v3381_v39 = vld [vmem:[%s3648_s3] ss:$0 sm:$0xff] }
 0x337   :  { %v1587_v1 = vmax.f32 %v1585_v52, %v1586_v53  ;;  %v1600_v55 = vrot.slane %v1599_v63, 4  ;;  %v1608_v61 = vmax.f32 %v1606_v50, %v1607_v54  ;;  %v1620_v3 = vsel %vm961_vm6, %v1528_v26, -inf }
 0x338   :  { %v1581_v2 = vrot.slane %v1580_v57, 2  ;;  %v1594_v4 = vmax.f32 %v1592_v41, %v1593_v62  ;;  %v1615_v5 = vmax.f32 %v1613_v56, %v1614_v0  ;;  %v1621_v8 = vrot.slane %v1620_v3, 4 }
 0x339   :  { %v1588_v9 = vrot.slane %v1587_v1, 2  ;;  %v1601_v51 = vmax.f32 %v1599_v63, %v1600_v55  ;;  %v1609_v7 = vrot.slane %v1608_v61, 2  ;;  %v1627_v18 = vsel %vm961_vm6, %v1529_v32, -inf }
 0x33a   :  { %v1582_v19 = vmax.f32 %v1580_v57, %v1581_v2  ;;  %v1595_v20 = vrot.slane %v1594_v4, 2  ;;  %v1616_v58 = vrot.slane %v1615_v5, 2  ;;  %v1622_v22 = vmax.f32 %v1620_v3, %v1621_v8 }
 0x33b   :  { %v1589_v23 = vmax.f32 %v1587_v1, %v1588_v9  ;;  %v1602_v24 = vrot.slane %v1601_v51, 2  ;;  %v1610_v27 = vmax.f32 %v1608_v61, %v1609_v7  ;;  %v1628_v28 = vrot.slane %v1627_v18, 4 }
 0x33c   :  { %v1583_v34 = vrot.slane %v1582_v19, 1  ;;  %v1596_v21 = vmax.f32 %v1594_v4, %v1595_v20  ;;  %v1617_v36 = vmax.f32 %v1615_v5, %v1616_v58  ;;  %v1623_v37 = vrot.slane %v1622_v22, 2 }
 0x33d   :  { %v1590_v38 = vrot.slane %v1589_v23, 1  ;;  %v1603_v29 = vmax.f32 %v1601_v51, %v1602_v24  ;;  %v1611_v59 = vrot.slane %v1610_v27, 1  ;;  %v1629_v40 = vmax.f32 %v1627_v18, %v1628_v28 }
 0x33e   :  { %v1584_v42 = vmax.f32 %v1582_v19, %v1583_v34  ;;  %v1597_v49 = vrot.slane %v1596_v21, 1  ;;  %v1618_v43 = vrot.slane %v1617_v36, 1  ;;  %v1624_v6 = vmax.f32 %v1622_v22, %v1623_v37 }
 0x33f   :  { %v1591_v44 = vmax.f32 %v1589_v23, %v1590_v38  ;;  %v1604_v45 = vrot.slane %v1603_v29, 1  ;;  %v1612_v26 = vmax.f32 %v1610_v27, %v1611_v59  ;;  %v1630_v46 = vrot.slane %v1629_v40, 2 }
 0x340   :  { %v1598_v50 = vmax.f32 %v1596_v21, %v1597_v49  ;;  %v1619_v48 = vmax.f32 %v1617_v36, %v1618_v43  ;;  %v1625_v32 = vrot.slane %v1624_v6, 1  ;;  %v1536_v52 = vrot.slane %v3359_v30, %v3201_v35 }
 0x341   :  { %v1605_v53 = vmax.f32 %v1603_v29, %v1604_v45  ;;  %v1631_v41 = vmax.f32 %v1629_v40, %v1630_v46  ;;  %v1690_v54 = vmax.f32 %v1584_v42, %v1591_v44  ;;  %v1544_v56 = vrot.slane %v1496_v60, %v3201_v35 }
 0x342   :  { %v1626_v57 = vmax.f32 %v1624_v6, %v1625_v32  ;;  %v1692_v62 = vmax.f32 %v1612_v26, %v1619_v48  ;;  %v1537_v63 = vcombine.high %v1536_v52, %v1536_v52  ;;  %v1552_v0 = vrot.slane %v3362_v25, %v3201_v35 }
 0x343   :  { %v1632_v1 = vrot.slane %v1631_v41, 1  ;;  %v1691_v55 = vmax.f32 %v1598_v50, %v1605_v53  ;;  %v3389_v61 = vadd.f32 %v3381_v39, %v1690_v54  ;;  %v1545_v3 = vcombine.high %v1544_v56, %v1544_v56 }
 0x344   :  { %v3392_v2 = vadd.f32 %v3381_v39, %v1692_v62  ;;  %v1553_v30 = vcombine.high %v1552_v0, %v1552_v0  ;;  %v1560_v60 = vrot.slane %v1497_v47, %v3201_v35  ;;  %v1634_v4 = vsel %vm961_vm6, %v1536_v52, -inf }
 0x345   :  { %v1633_v5 = vmax.f32 %v1631_v41, %v1632_v1  ;;  %v3400_v8 = vadd.f32 %v3381_v39, %v1691_v55  ;;  %v1713_v9 = vmax.f32 %v3389_v61, 0.0  ;;  %v1635_v51 = vrot.slane %v1634_v4, 4 }
 0x346   :  { %v1715_v7 = vmax.f32 %v3392_v2, 0.0  ;;  %v1561_v18 = vcombine.high %v1560_v60, %v1560_v60  ;;  %v1641_v19 = vsel %vm961_vm6, %v1537_v63, -inf  ;;  %v1648_v20 = vsel %vm961_vm6, %v1544_v56, -inf }
 0x347   :  { %v1693_v58 = vmax.f32 %v1626_v57, %v1633_v5  ;;  %v1714_v25 = vmax.f32 %v3400_v8, 0.0  ;;  %v1636_v35 = vmax.f32 %v1634_v4, %v1635_v51  ;;  %v1642_v47 = vrot.slane %v1641_v19, 4 }
 0x348   :  { %v1649_v22 = vrot.slane %v1648_v20, 4  ;;  %v1655_v23 = vsel %vm961_vm6, %v1545_v3, -inf  ;;  %v1662_v24 = vsel %vm961_vm6, %v1552_v0, -inf  ;;  %v1669_v27 = vsel %vm961_vm6, %v1553_v30, -inf }
 0x349   :  { %v3411_v28 = vadd.f32 %v3381_v39, %v1693_v58  ;;  %v1637_v34 = vrot.slane %v1636_v35, 2  ;;  %v1643_v21 = vmax.f32 %v1641_v19, %v1642_v47  ;;  %v1656_v36 = vrot.slane %v1655_v23, 4 }
 0x34a   :  { %v1650_v37 = vmax.f32 %v1648_v20, %v1649_v22  ;;  %v1663_v38 = vrot.slane %v1662_v24, 4  ;;  %v1670_v29 = vrot.slane %v1669_v27, 4  ;;  %v1676_v59 = vsel %vm961_vm6, %v1560_v60, -inf }
 0x34b   :  { %v1716_v40 = vmax.f32 %v3411_v28, 0.0  ;;  %v1638_v42 = vmax.f32 %v1636_v35, %v1637_v34  ;;  %v1644_v49 = vrot.slane %v1643_v21, 2  ;;  %v1657_v43 = vmax.f32 %v1655_v23, %v1656_v36 }
 0x34c   :  { %v1651_v6 = vrot.slane %v1650_v37, 2  ;;  %v1664_v44 = vmax.f32 %v1662_v24, %v1663_v38  ;;  %v1671_v45 = vmax.f32 %v1669_v27, %v1670_v29  ;;  %v1677_v26 = vrot.slane %v1676_v59, 4 }
 0x34d   :  { %v1639_v46 = vrot.slane %v1638_v42, 1  ;;  %v1645_v50 = vmax.f32 %v1643_v21, %v1644_v49  ;;  %v1658_v48 = vrot.slane %v1657_v43, 2  ;;  %v1683_v32 = vsel %vm961_vm6, %v1561_v18, -inf }
 0x34e   :  { %v1652_v52 = vmax.f32 %v1650_v37, %v1651_v6  ;;  %v1665_v53 = vrot.slane %v1664_v44, 2  ;;  %v1672_v41 = vrot.slane %v1671_v45, 2  ;;  %v1678_v54 = vmax.f32 %v1676_v59, %v1677_v26 }
 0x34f   :  { %v1646_v56 = vrot.slane %v1645_v50, 1  ;;  %v1659_v57 = vmax.f32 %v1657_v43, %v1658_v48  ;;  %v1684_v62 = vrot.slane %v1683_v32, 4  ;;  %v1640_v3 = vmax.f32 %v1638_v42, %v1639_v46 }
 0x350   :  { %v1653_v63 = vrot.slane %v1652_v52, 1  ;;  %v1666_v0 = vmax.f32 %v1664_v44, %v1665_v53  ;;  %v1673_v1 = vmax.f32 %v1671_v45, %v1672_v41  ;;  %v1679_v55 = vrot.slane %v1678_v54, 2 }
 0x351   :  { %v1647_v30 = vmax.f32 %v1645_v50, %v1646_v56  ;;  %v1660_v60 = vrot.slane %v1659_v57, 1  ;;  %v1685_v4 = vmax.f32 %v1683_v32, %v1684_v62  ;;  %v1725_v45 = vpack.c.bf16 %v1713_v9, %v1713_v9 }
 0x352   :  { %v1667_v5 = vrot.slane %v1666_v0, 1  ;;  %v1674_v51 = vrot.slane %v1673_v1, 1  ;;  %v1680_v19 = vmax.f32 %v1678_v54, %v1679_v55  ;;  %v1654_v20 = vmax.f32 %v1652_v52, %v1653_v63 }
 0x353   :  { %v1661_v18 = vmax.f32 %v1659_v57, %v1660_v60  ;;  %v1686_v58 = vrot.slane %v1685_v4, 2  ;;  %v1694_v35 = vmax.f32 %v1640_v3, %v1647_v30  ;;  %v1726_v26 = vpack.c.bf16 %v1714_v25, %v1714_v25 }
 0x354   :  { %v1668_v47 = vmax.f32 %v1666_v0, %v1667_v5  ;;  %v1675_v22 = vmax.f32 %v1673_v1, %v1674_v51  ;;  %v1681_v23 = vrot.slane %v1680_v19, 1 }
 0x355   :  { %v1687_v24 = vmax.f32 %v1685_v4, %v1686_v58  ;;  %v1695_v27 = vmax.f32 %v1654_v20, %v1661_v18  ;;  %v1709_v28 = vadd.f32 %v3381_v39, %v1694_v35 }
 0x356   :  { %v1696_v34 = vmax.f32 %v1668_v47, %v1675_v22  ;;  %v1682_v29 = vmax.f32 %v1680_v19, %v1681_v23 }
 0x357   :  { %v1688_v21 = vrot.slane %v1687_v24, 1  ;;  %v1710_v36 = vadd.f32 %v3381_v39, %v1695_v27  ;;  %v1717_v37 = vmax.f32 %v1709_v28, 0.0 }
 0x358   :  { %v1711_v38 = vadd.f32 %v3381_v39, %v1696_v34 }
 0x359   :  { %v1689_v59 = vmax.f32 %v1687_v24, %v1688_v21  ;;  %v1718_v42 = vmax.f32 %v1710_v36, 0.0 }
 0x35a   :  { %v1719_v49 = vmax.f32 %v1711_v38, 0.0 }
 0x35b   :  { %v1697_v43 = vmax.f32 %v1682_v29, %v1689_v59 }
 0x35d   :  { %v1712_v6 = vadd.f32 %v3381_v39, %v1697_v43 }
 0x35f   :  { %v1720_v44 = vmax.f32 %v1712_v6, 0.0 }
 0x360   :  { %2788 = dma.done.wait [#allocation4 + $0x1], 1024 }
 0x361   :  { %2789 = vsyncadd [#allocation4 + $0x1], 4294966272  ;;  %v2794_v46 = vmov 0.0   ;;  %vm2795_vm15 = vmmov 0   ;;  %v1727_v39 = vpack.c.bf16 %v1715_v7, %v1715_v7  ;;  %v3432_v61 = vpack.c.bf16 %v1716_v40, %v1716_v40  ;;  %s2798_s0 = smov 96  }
 0x362   :  { %2620 = vmatprep.subr.bf16.mxu0 %v2794_v46  ;;  %2636 = vmatprep.mubr.msk.bf16.mxu0 %vm2795_vm15, %v2794_v46  ;;  %v1729_v9 = vpack.c.bf16 %v1717_v37, %v1717_v37  ;;  %v1757_v8 = vunpack.c.l.b16 %v1726_v26  ;;  %v1756_v2 = vunpack.c.l.b16 %v1725_v45  ;;  %vm1765_vm0 = vcmask 1041409   ;;  %v2743_v45 = vld [vmem:[%s3651_s6 + $0x8] sm:$0xff]   ;;  %v2744_v26 = vld [vmem:[%s3651_s6 + $0x10] sm:$0xff]  }
 0x363   :  { %2621 = vmatpush3.bf16.msra.mxu0 %v3104_v10  ;;  %2684 = vmatprep.subr.bf16.mxu1 %v2794_v46  ;;  %v1758_v25 = vunpack.c.l.b16 %v1727_v39  ;;  %v1759_v50 = vunpack.c.l.b16 %v3432_v61  ;;  %v1730_v52 = vpack.c.bf16 %v1718_v42, %v1718_v42  ;;  %v1731_v41 = vpack.c.bf16 %v1719_v49, %v1719_v49  ;;  %v3546_v61 = vld [vmem:[%s3649_s4 + $0x8] sm:$0xff]  }
 0x364   :  { %2622 = vmatprep.subr.bf16.mxu0 %v2794_v46  ;;  %v1760_v48 = vunpack.c.l.b16 %v1729_v9  ;;  %2688 = vmatprep.mubr.msk.bf16.mxu1 %vm2795_vm15, %v2794_v46  ;;  %v1764_v32 = vrot.slane %v1757_v8, 7  ;;  %v2796_v4 = vmov 0.5   ;;  %v1965_v34 = vsub.s32 0, %v3198_v33  ;;  %v2745_v9 = vld [vmem:[%s3651_s6 + $0x18] sm:$0xff]   ;;  %v2746_v8 = vld [vmem:[%s3651_s6 + $0x20] sm:$0xff]  }
 0x365   :  { %v1767_v7 = vrot.slane %v1758_v25, 6  ;;  %v1769_v10 = vrot.slane %v1759_v50, 5  ;;  %v1761_v56 = vunpack.c.l.b16 %v1730_v52  ;;  %v1762_v62 = vunpack.c.l.b16 %v1731_v41  ;;  %v2747_v25 = vld [vmem:[%s3651_s6 + $0x28] sm:$0xff]  }
 0x366   :  { %v1771_v40 = vrot.slane %v1760_v48, 4  ;;  %v1766_v53 = vsel %vm1765_vm0, %v1764_v32, %v1756_v2  ;;  %v2748_v2 = vld [vmem:[%s3651_s6 + $0x30] sm:$0xff]   ;;  %v2749_v32 = vld [vmem:[%s3651_s6 + $0x38] sm:$0xff]   ;;  %vm2505_vm5 = vcmask 1024  }
 0x367   :  { %2623 = vmatpush3.bf16.msra.mxu0 %v3109_v11  ;;  %v1768_v54 = vsel %vm1259_vm7, %v1767_v7, %v1766_v53  ;;  %v3449_v11 = vpack.c.bf16 %v1720_v44, %v1720_v44  ;;  %v1773_v63 = vrot.slane %v1761_v56, 3  ;;  %v1775_v1 = vrot.slane %v1762_v62, 2  ;;  %v2742_v44 = vld [vmem:[%s3651_s6] sm:$0xff]  }
 0x368   :  { %2624 = vmatprep.subr.bf16.mxu0 %v2794_v46  ;;  %v1770_v57 = vsel %vm1262_vm8, %v1769_v10, %v1768_v54 }
 0x369   :  { %v1772_v0 = vsel %vm1265_vm9, %v1771_v40, %v1770_v57  ;;  %v3539_v40 = vld [vmem:[%s3649_s4] sm:$0xff]  }
 0x36a   :  { %v1774_v55 = vsel %vm1268_vm10, %v1773_v63, %v1772_v0 }
 0x36b   :  { %2625 = vmatpush3.bf16.msra.mxu0 %v3114_v12  ;;  %v1763_v12 = vunpack.c.l.b16 %v3449_v11  ;;  %v1776_v3 = vsel %vm1271_vm11, %v1775_v1, %v1774_v55 }
 0x36c   :  { %2626 = vmatprep.subr.bf16.mxu0 %v2794_v46 }
 0x36d   :  { %v1847_v48 = vrot.slane %v1763_v12, 7 }
 0x36f   :  { %2627 = vmatpush3.bf16.msra.mxu0 %v3119_v13  ;;  %v1777_v13 = vrot.slane %v1763_v12, 1  ;;  %v1848_v7 = vsel %vm1765_vm0, %v1847_v48, %v1759_v50 }
 0x370   :  { %2628 = vmatprep.subr.bf16.mxu0 %v2794_v46  ;;  %v1849_v10 = vpack.c.b16 %v1848_v7, %v1848_v7 }
 0x373   :  { %2629 = vmatpush3.bf16.msra.mxu0 %v3124_v14  ;;  %v1778_v14 = vsel %vm1274_vm12, %v1777_v13, %v1776_v3 }
 0x374   :  { %2630 = vmatprep.subr.bf16.mxu0 %v2794_v46  ;;  %v1779_v30 = vpack.c.b16 %v1778_v14, %v1778_v14 }
 0x377   :  { %2631 = vmatpush3.bf16.msra.mxu0 %v3129_v15  ;;  %v1940_v15 = vand.u32 127, %v734_v31 }
 0x378   :  { %2632 = vmatprep.subr.bf16.mxu0 %v2794_v46 }
 0x379   :  { %vm1941_vm1 = vcmp.ge.s32.totalorder %v1940_v15, 64  ;;  %vm1942_vm2 = vcmp.lt.s32.totalorder %v1940_v15, 96 }
 0x37a   :  { %vm3471_vm3 = vmand %vm1941_vm1, %vm1942_vm2 }
 0x37b   :  { %2633 = vmatpush3.bf16.msra.mxu0 %v3134_v16  ;;  %v2561_v16 = vld [vmem:[%s3650_s5] ss:$0 sm:$0xff]  ;;  %s2797_s5 = smov 64  }
 0x37c   :  { %2634 = vmatprep.subr.bf16.mxu0 %v2794_v46 }
 0x37f   :  { %2635 = vmatpush3.bf16.msra.mxu0 %v3139_v17  ;;  %v3480_v17 = vsel %vm3471_vm3, 1.0, %v2796_v4 }
 0x380   :  { %2640 = vmatprep.subr.bf16.mxu0 %v2794_v46  ;;  %v1950_v31 = vrot.slane %v3480_v17, 1  ;;  %v2062_v12 = vrot.slane %v3480_v17, 7 }
 0x382   :  { %2637 = vmatmul.mubr.bf16.vlgmr.msra.gmra.mrb[8].mxu0 %v1779_v30 }
 0x383   :  { %2656 = vmatprep.mubr.msk.bf16.mxu0 %vm2795_vm15, %v2794_v46  ;;  %2641 = vmatpush3.bf16.msra.mxu0 %v2742_v44 }
 0x384   :  { %2642 = vmatprep.subr.bf16.mxu0 %v2794_v46 }
 0x387   :  { %2643 = vmatpush3.bf16.msra.mxu0 %v2743_v45 }
 0x388   :  { %2644 = vmatprep.subr.bf16.mxu0 %v2794_v46 }
 0x38b   :  { %2645 = vmatpush3.bf16.msra.mxu0 %v2744_v26  ;;  %v2172_v26 = vrot.slane %v3480_v17, 6 }
 0x38c   :  { %2646 = vmatprep.subr.bf16.mxu0 %v2794_v46 }
 0x38f   :  { %2647 = vmatpush3.bf16.msra.mxu0 %v2745_v9 }
 0x390   :  { %2648 = vmatprep.subr.bf16.mxu0 %v2794_v46 }
 0x393   :  { %2649 = vmatpush3.bf16.msra.mxu0 %v2746_v8 }
 0x394   :  { %2650 = vmatprep.subr.bf16.mxu0 %v2794_v46 }
 0x397   :  { %2651 = vmatpush3.bf16.msra.mxu0 %v2747_v25 }
 0x398   :  { %2652 = vmatprep.subr.bf16.mxu0 %v2794_v46 }
 0x39b   :  { %2653 = vmatpush3.bf16.msra.mxu0 %v2748_v2 }
 0x39c   :  { %2654 = vmatprep.subr.bf16.mxu0 %v2794_v46 }
 0x39f   :  { %2655 = vmatpush3.bf16.msra.mxu0 %v2749_v32 }
 0x3a0   :  { %2660 = vmatprep.subr.bf16.mxu0 %v2794_v46 }
 0x3a2   :  { %2657 = vmatmul.mubr.bf16.vlgmr.msra.gmra.mrb[12].mxu0 %v1849_v10  ;;  %v2186_v10 = vsub.s32 2, %v3198_v33 }
 0x3a3   :  { %2661 = vmatpush3.bf16.msra.mxu0 %v3539_v40  ;;  %2664 = vmatprep.mubr.msk.bf16.mxu0 %vm2795_vm15, %v2794_v46 }
 0x3a4   :  { %2662 = vmatprep.subr.bf16.mxu0 %v2794_v46 }
 0x3a7   :  { %2663 = vmatpush3.bf16.msra.mxu0 %v3546_v61 }
 0x3a8   :  { %2668 = vmatprep.subr.bf16.mxu0 %v2794_v46 }
 0x455   :  { %v1815_v5 = vpop.f32.mrb[8].mxu0 }
 0x456   :  { %v3482_v51 = vadd.f32 %v2561_v16, %v1815_v5  ;;  %v2638_v19 = vpop.f32.mrb[9].mxu0 }
 0x457   :  { %v1818_v20 = vpop.f32.mrb[10].mxu0 }
 0x458   :  { %v3487_v18 = vcombine.high %v3482_v51, %v3482_v51  ;;  %v2639_v58 = vpop.f32.mrb[11].mxu0  ;;  %v1953_v35 = vmul.f32 %v3480_v17, %v3482_v51 }
 0x45a   :  { %v1954_v47 = vmul.f32 %v1950_v31, %v3487_v18  ;;  %2756 = vtanh.f32 %v1953_v35  ;;  %v2076_v31 = vsub.s32 1, %v3198_v33 }
 0x45c   :  { %2758 = vtanh.f32 %v1954_v47 }
 0x464   :  { %v2757_v22 = vpop.eup %2756 }
 0x465   :  { %v1957_v23 = vmul.f32 0.5, %v2757_v22  ;;  %v1966_v37 = vrot.slane %v2757_v22, %v1965_v34 }
 0x466   :  { %v2759_v24 = vpop.eup %2758 }
 0x467   :  { %v1958_v27 = vmul.f32 0.5, %v2759_v24  ;;  %v1959_v28 = vadd.f32 0.5, %v1957_v23  ;;  %v1970_v36 = vrot.slane %v2759_v24, %v1965_v34 }
 0x469   :  { %v1960_v21 = vadd.f32 0.5, %v1958_v27  ;;  %v1978_v38 = vrot.slane %v1959_v28, %v1965_v34  ;;  %v1971_v59 = vsel %vm1765_vm0, %v1970_v36, %v1966_v37 }
 0x46b   :  { %v1982_v29 = vrot.slane %v1960_v21, %v1965_v34 }
 0x46d   :  { %v1983_v42 = vsel %vm1765_vm0, %v1982_v29, %v1978_v38 }
 0x46e   :  { %v1985_v49 = vsel %vm3471_vm3, %v1971_v59, %v1983_v42 }
 0x46f   :  { %1987 = vrot.lane.b32.xlu0 %v1985_v49, %s2797_s5 }
 0x475   :  { %v3555_v54 = vpop.f32.mrb[12].mxu0 }
 0x476   :  { %v2658_v56 = vpop.f32.mrb[13].mxu0 }
 0x477   :  { %v1936_v11 = vpop.f32.mrb[14].mxu0 }
 0x478   :  { %v2659_v57 = vpop.f32.mrb[15].mxu0 }
 0x4e1   :  { %v1988_v43 = vpop.permute.xlu0 %1987 }
 0x4e2   :  { %v1990_v6 = vmul.f32 %v1988_v43, %v1985_v49 }
 0x4e4   :  { %2760 = vtanh.f32 %v1990_v6 }
 0x4ee   :  { %v2761_v39 = vpop.eup %2760 }
 0x4ef   :  { %1993 = vrot.lane.b32.xlu0 %v2761_v39, %s2798_s0 }
 0x4f3   :  { %2098 = vrot.lane.b32.xlu0 %v1990_v6, %s2792_s23 }
 0x561   :  { %v1994_v50 = vpop.permute.xlu0 %1993 }
 0x562   :  { %v1996_v52 = vmul.f32 %v1994_v50, %v1985_v49 }
 0x564   :  { %v1997_v53 = vpack.c.bf16 %v1996_v52, %v1996_v52 }
 0x565   :  { %v2099_v21 = vpop.permute.xlu0 %2098 }
 0x566   :  { %1999 = vrot.lane.b32.xlu1 %v1997_v53, %s2792_s23 }
 0x5d8   :  { %v2000_v41 = vpop.permute.xlu1 %1999 }
 0x5d9   :  { %2665 = vmatmul.mubr.msk.bf16.vlgmr.msra.gmra.mrb[16].mxu0 %vm618_vm4, %v2000_v41 }
 0x5da   :  { %2669 = vmatpush3.bf16.msra.mxu0 %v3539_v40  ;;  %2672 = vmatprep.mubr.msk.bf16.mxu0 %vm2795_vm15, %v2794_v46 }
 0x5db   :  { %2670 = vmatprep.subr.bf16.mxu0 %v2794_v46 }
 0x5de   :  { %2671 = vmatpush3.bf16.msra.mxu0 %v3546_v61 }
 0x5df   :  { %2676 = vmatprep.subr.bf16.mxu0 %v2794_v46 }
 0x6ac   :  { %v2050_v62 = vpop.f32.mrb[16].mxu0 }
 0x6ad   :  { %v2057_v63 = vrot.slane %v2050_v62, 7  ;;  %v2061_v0 = vadd.f32 %v2050_v62, %v3487_v18  ;;  %v2666_v1 = vpop.f32.mrb[17].mxu0 }
 0x6ae   :  { %v2053_v55 = vpop.f32.mrb[18].mxu0 }
 0x6af   :  { %v2060_v13 = vadd.f32 %v2057_v63, %v3482_v51  ;;  %v2065_v3 = vmul.f32 %v2061_v0, %v3480_v17  ;;  %v2667_v14 = vpop.f32.mrb[19].mxu0 }
 0x6b1   :  { %v2064_v30 = vmul.f32 %v2062_v12, %v2060_v13  ;;  %2762 = vtanh.f32 %v2065_v3 }
 0x6b3   :  { %2764 = vtanh.f32 %v2064_v30 }
 0x6bb   :  { %v2763_v15 = vpop.eup %2762 }
 0x6bc   :  { %v2069_v16 = vmul.f32 0.5, %v2763_v15  ;;  %v2081_v35 = vrot.slane %v2763_v15, %v2076_v31 }
 0x6bd   :  { %v2765_v4 = vpop.eup %2764 }
 0x6be   :  { %v2068_v5 = vmul.f32 0.5, %v2765_v4  ;;  %v2071_v19 = vadd.f32 0.5, %v2069_v16  ;;  %v2077_v58 = vrot.slane %v2765_v4, %v2076_v31 }
 0x6c0   :  { %v2070_v20 = vadd.f32 0.5, %v2068_v5  ;;  %v2093_v22 = vrot.slane %v2071_v19, %v2076_v31  ;;  %v2082_v23 = vsel %vm1765_vm0, %v2081_v35, %v2077_v58  ;;  %v2562_v5 = vld [vmem:[%s3652_s7] ss:$0 sm:$0xff]  ;;  %v2278_v35 = vrot.slane %v3480_v17, 5 }
 0x6c2   :  { %v2089_v47 = vrot.slane %v2070_v20, %v2076_v31  ;;  %v1934_v31 = vadd.f32 %v2562_v5, %v3555_v54  ;;  %v2292_v54 = vsub.s32 3, %v3198_v33  ;;  %v2583_v5 = vld [vmem:[%s3656_s11] ss:$0 sm:$0xff] }
 0x6c4   :  { %v2094_v24 = vsel %vm1765_vm0, %v2093_v22, %v2089_v47 }
 0x6c5   :  { %v2096_v27 = vsel %vm3471_vm3, %v2082_v23, %v2094_v24 }
 0x6c6   :  { %2103 = vrot.lane.b32.xlu1 %v2096_v27, %s2797_s5  ;;  %v2101_v36 = vmul.f32 %v2099_v21, %v2096_v27 }
 0x738   :  { %v2104_v28 = vpop.permute.xlu1 %2103 }
 0x739   :  { %v2106_v34 = vmul.f32 %v2104_v28, %v2096_v27  ;;  %v2330_v28 = vmul.f32 %v3480_v17, %v1934_v31 }
 0x73b   :  { %2108 = vrot.lane.b32.xlu1 %v2106_v34, %s2792_s23 }
 0x7ad   :  { %v2109_v37 = vpop.permute.xlu1 %2108 }
 0x7ae   :  { %v2111_v38 = vadd.f32 %v2109_v37, %v2101_v36 }
 0x7b0   :  { %2766 = vtanh.f32 %v2111_v38 }
 0x7ba   :  { %v2767_v29 = vpop.eup %2766 }
 0x7bb   :  { %2114 = vrot.lane.b32.xlu0 %v2767_v29, %s2797_s5 }
 0x82d   :  { %v2115_v59 = vpop.permute.xlu0 %2114 }
 0x82e   :  { %v2117_v42 = vmul.f32 %v2115_v59, %v2096_v27 }
 0x830   :  { %v2118_v49 = vpack.c.bf16 %v2117_v42, %v2117_v42 }
 0x832   :  { %2120 = vrot.lane.b32.xlu1 %v2118_v49, %s2792_s23 }
 0x8a4   :  { %v2121_v43 = vpop.permute.xlu1 %2120 }
 0x8a5   :  { %2673 = vmatmul.mubr.msk.bf16.vlgmr.msra.gmra.mrb[20].mxu0 %vm618_vm4, %v2121_v43 }
 0x8a6   :  { %2677 = vmatpush3.bf16.msra.mxu0 %v3539_v40  ;;  %2680 = vmatprep.mubr.msk.bf16.mxu0 %vm2795_vm15, %v2794_v46 }
 0x8a7   :  { %2678 = vmatprep.subr.bf16.mxu0 %v2794_v46 }
 0x8aa   :  { %2679 = vmatpush3.bf16.msra.mxu0 %v3546_v61 }
 0x8ab   :  { %2692 = vmatprep.subr.bf16.mxu0 %v2794_v46 }
 0x978   :  { %v2159_v6 = vpop.f32.mrb[20].mxu0 }
 0x979   :  { %v2166_v44 = vrot.slane %v2159_v6, 6  ;;  %v2167_v45 = vrot.slane %v2159_v6, 7  ;;  %v2674_v39 = vpop.f32.mrb[21].mxu0 }
 0x97a   :  { %v2162_v9 = vpop.f32.mrb[22].mxu0 }
 0x97b   :  { %v2170_v8 = vadd.f32 %v2166_v44, %v3482_v51  ;;  %v2171_v25 = vadd.f32 %v2167_v45, %v3487_v18  ;;  %v2675_v48 = vpop.f32.mrb[23].mxu0 }
 0x97d   :  { %v2174_v2 = vmul.f32 %v2172_v26, %v2170_v8  ;;  %v2175_v32 = vmul.f32 %v2171_v25, %v2062_v12 }
 0x97f   :  { %2768 = vtanh.f32 %v2174_v2  ;;  %v2752_v2 = vld [vmem:[%s3654_s9] sm:$0xff]  }
 0x980   :  { %2770 = vtanh.f32 %v2175_v32  ;;  %2685 = vmatpush3.bf16.msra.mxu1 %v2752_v2 }
 0x981   :  { %2686 = vmatprep.subr.bf16.mxu1 %v2794_v46 }
 0x989   :  { %v2769_v7 = vpop.eup %2768 }
 0x98a   :  { %v2771_v40 = vpop.eup %2770  ;;  %v2178_v61 = vmul.f32 0.5, %v2769_v7  ;;  %v2187_v41 = vrot.slane %v2769_v7, %v2186_v10 }
 0x98b   :  { %v2179_v50 = vmul.f32 0.5, %v2771_v40  ;;  %v2191_v56 = vrot.slane %v2771_v40, %v2186_v10  ;;  %v2753_v40 = vld [vmem:[%s3654_s9 + $0x8] sm:$0xff]  }
 0x98c   :  { %v2180_v52 = vadd.f32 0.5, %v2178_v61  ;;  %2687 = vmatpush3.bf16.msra.mxu1 %v2753_v40  ;;  %v2754_v61 = vld [vmem:[%s3653_s8] sm:$0xff]  }
 0x98d   :  { %v2181_v53 = vadd.f32 0.5, %v2179_v50  ;;  %v2192_v62 = vsel %vm1765_vm0, %v2191_v56, %v2187_v41  ;;  %v2755_v50 = vld [vmem:[%s3653_s8 + $0x8] sm:$0xff]  }
 0x98e   :  { %v2199_v11 = vrot.slane %v2180_v52, %v2186_v10 }
 0x98f   :  { %v2203_v57 = vrot.slane %v2181_v53, %v2186_v10 }
 0x991   :  { %v2204_v63 = vsel %vm1765_vm0, %v2203_v57, %v2199_v11 }
 0x992   :  { %v2206_v0 = vsel %vm3471_vm3, %v2192_v62, %v2204_v63 }
 0x993   :  { %2209 = vrot.lane.b32.xlu0 %v2206_v0, %s2797_s5  ;;  %v2207_v55 = vmul.f32 %v2206_v0, %v2111_v38 }
 0xa05   :  { %v2210_v12 = vpop.permute.xlu0 %2209 }
 0xa06   :  { %v2212_v1 = vmul.f32 %v2210_v12, %v2206_v0 }
 0xa08   :  { %2214 = vrot.lane.b32.xlu1 %v2212_v1, %s2792_s23 }
 0xa7a   :  { %v2215_v13 = vpop.permute.xlu1 %2214 }
 0xa7b   :  { %v2217_v3 = vadd.f32 %v2215_v13, %v2207_v55 }
 0xa7d   :  { %2772 = vtanh.f32 %v2217_v3 }
 0xa87   :  { %v2773_v14 = vpop.eup %2772 }
 0xa88   :  { %2220 = vrot.lane.b32.xlu0 %v2773_v14, %s2797_s5 }
 0xafa   :  { %v2221_v30 = vpop.permute.xlu0 %2220 }
 0xafb   :  { %v2223_v15 = vmul.f32 %v2221_v30, %v2206_v0 }
 0xafd   :  { %v2224_v16 = vpack.c.bf16 %v2223_v15, %v2223_v15 }
 0xaff   :  { %2226 = vrot.lane.b32.xlu1 %v2224_v16, %s2792_s23 }
 0xb71   :  { %v2227_v4 = vpop.permute.xlu1 %2226 }
 0xb72   :  { %2681 = vmatmul.mubr.msk.bf16.vlgmr.msra.gmra.mrb[24].mxu0 %vm618_vm4, %v2227_v4 }
 0xb73   :  { %2696 = vmatprep.mubr.msk.bf16.mxu0 %vm2795_vm15, %v2794_v46  ;;  %2693 = vmatpush3.bf16.msra.mxu0 %v2754_v61 }
 0xb74   :  { %2694 = vmatprep.subr.bf16.mxu0 %v2794_v46 }
 0xb77   :  { %2695 = vmatpush3.bf16.msra.mxu0 %v2755_v50 }
 0xc45   :  { %v2265_v19 = vpop.f32.mrb[24].mxu0 }
 0xc46   :  { %v2272_v20 = vrot.slane %v2265_v19, 5  ;;  %v2273_v58 = vrot.slane %v2265_v19, 6  ;;  %v2682_v47 = vpop.f32.mrb[25].mxu0 }
 0xc47   :  { %v2268_v22 = vpop.f32.mrb[26].mxu0 }
 0xc48   :  { %v2276_v23 = vadd.f32 %v2272_v20, %v3482_v51  ;;  %v2277_v24 = vadd.f32 %v2273_v58, %v3487_v18  ;;  %v2683_v27 = vpop.f32.mrb[27].mxu0  ;;  %v2584_v58 = vld [vmem:[#allocation5] ss:$0 sm:$0xff] }
 0xc4a   :  { %v2280_v34 = vmul.f32 %v2278_v35, %v2276_v23  ;;  %v2281_v21 = vmul.f32 %v2277_v24, %v2172_v26 }
 0xc4c   :  { %2774 = vtanh.f32 %v2280_v34 }
 0xc4d   :  { %2776 = vtanh.f32 %v2281_v21 }
 0xc4e   :  { %2778 = vtanh.f32 %v2330_v28 }
 0xc56   :  { %v2775_v36 = vpop.eup %2774 }
 0xc57   :  { %v2777_v37 = vpop.eup %2776  ;;  %v2284_v38 = vmul.f32 0.5, %v2775_v36  ;;  %v2293_v51 = vrot.slane %v2775_v36, %v2292_v54 }
 0xc58   :  { %v2779_v29 = vpop.eup %2778  ;;  %v2285_v59 = vmul.f32 0.5, %v2777_v37  ;;  %v2297_v43 = vrot.slane %v2777_v37, %v2292_v54 }
 0xc59   :  { %v2286_v42 = vadd.f32 0.5, %v2284_v38  ;;  %v2332_v6 = vmul.f32 0.5, %v2779_v29 }
 0xc5a   :  { %v2287_v49 = vadd.f32 0.5, %v2285_v59  ;;  %v2298_v17 = vsel %vm1765_vm0, %v2297_v43, %v2293_v51 }
 0xc5b   :  { %v2305_v18 = vrot.slane %v2286_v42, %v2292_v54  ;;  %v2333_v39 = vadd.f32 0.5, %v2332_v6 }
 0xc5c   :  { %v2309_v44 = vrot.slane %v2287_v49, %v2292_v54 }
 0xc5d   :  { %v2334_v33 = vsel %vm3471_vm3, %v2779_v29, %v2333_v39 }
 0xc5e   :  { %v2310_v45 = vsel %vm1765_vm0, %v2309_v44, %v2305_v18 }
 0xc5f   :  { %v2312_v26 = vsel %vm3471_vm3, %v2298_v17, %v2310_v45 }
 0xc60   :  { %2315 = vrot.lane.b32.xlu0 %v2312_v26, %s2797_s5  ;;  %v2313_v60 = vmul.f32 %v2312_v26, %v2217_v3  ;;  %v2582_v3 = vld [vmem:[%s3655_s10] ss:$0 sm:$0xff] }
 0xc64   :  { %2336 = vrot.lane.b32.xlu0 %v2334_v33, %s2797_s5 }
 0xcd2   :  { %v2316_v9 = vpop.permute.xlu0 %2315 }
 0xcd3   :  { %v2318_v8 = vmul.f32 %v2316_v9, %v2312_v26 }
 0xcd5   :  { %2320 = vrot.lane.b32.xlu1 %v2318_v8, %s2792_s23 }
 0xcd6   :  { %v2337_v25 = vpop.permute.xlu0 %2336 }
 0xcd7   :  { %v2339_v48 = vmul.f32 %v2337_v25, %v2334_v33 }
 0xcd9   :  { %2780 = vtanh.f32 %v2339_v48 }
 0xce3   :  { %v2781_v32 = vpop.eup %2780 }
 0xce4   :  { %2342 = vrot.lane.b32.xlu0 %v2781_v32, %s2798_s0 }
 0xd47   :  { %v2321_v7 = vpop.permute.xlu1 %2320 }
 0xd48   :  { %v2323_v10 = vadd.f32 %v2321_v7, %v2313_v60 }
 0xd4a   :  { %2782 = vtanh.f32 %v2323_v10 }
 0xd54   :  { %v2783_v52 = vpop.eup %2782 }
 0xd55   :  { %2326 = vrot.lane.b32.xlu1 %v2783_v52, %s2797_s5 }
 0xd56   :  { %v2343_v53 = vpop.permute.xlu0 %2342 }
 0xd57   :  { %v2345_v41 = vmul.f32 %v2343_v53, %v2334_v33 }
 0xd59   :  { %v2351_v56 = vpack.c.bf16 %v2345_v41, %v2345_v41 }
 0xd5b   :  { %2357 = vrot.lane.b32.xlu1 %v2351_v56, %s2792_s23 }
 0xdc7   :  { %v2327_v11 = vpop.permute.xlu1 %2326 }
 0xdc8   :  { %v2329_v57 = vmul.f32 %v2327_v11, %v2312_v26 }
 0xdca   :  { %v2346_v62 = vpack.c.bf16 %v2329_v57, %v2329_v57 }
 0xdcc   :  { %2415 = vrot.lane.b32.xlu0 %v2346_v62, %s2792_s23 }
 0xdcd   :  { %v2358_v63 = vpop.permute.xlu1 %2357 }
 0xdce   :  { %2689 = vmatmul.mubr.msk.bf16.vlgmr.msra.gmra.mrb[4].mxu1 %vm618_vm4, %v2358_v63 }
 0xe3e   :  { %v2416_v0 = vpop.permute.xlu0 %2415 }
 0xe3f   :  { %2697 = vmatmul.mubr.msk.bf16.vlgmr.msra.gmra.mrb[28].mxu0 %vm618_vm4, %v2416_v0  ;;  %vm2489_vm4 = vcmask 517120  }
 0xea1   :  { %v2408_v46 = vpop.f32.mrb[4].mxu1 }
 0xea2   :  { %v2690_v12 = vpop.f32.mrb[5].mxu1 }
 0xea3   :  { %v2411_v1 = vpop.f32.mrb[6].mxu1 }
 0xea4   :  { %v2691_v55 = vpop.f32.mrb[7].mxu1 }
 0xf12   :  { %v2466_v13 = vpop.f32.mrb[28].mxu0 }
 0xf13   :  { %v2467_v14 = vadd.f32 %v2466_v13, %v2408_v46  ;;  %v2698_v30 = vpop.f32.mrb[29].mxu0 }
 0xf14   :  { %v2469_v15 = vpop.f32.mrb[30].mxu0 }
 0xf15   :  { %v2479_v16 = vadd.f32 %v2582_v3, %v2467_v14  ;;  %v2699_v4 = vpop.f32.mrb[31].mxu0 }
 0xf17   :  { %v2480_v19 = vmax.f32 %v2479_v16, 0.0 }
 0xf19   :  { %v2488_v31 = vmul.f32 %v2583_v5, %v2480_v19 }
 0xf1b   :  { %v2490_v20 = vsel %vm2489_vm4, %v2488_v31, 0.0 }
 0xf1c   :  { %2491 = vadd.xlane.f32.xlu1 %v2490_v20 }
 0xfa9   :  { %v2492_v35 = vpop.xlane.xlu1 %2491 }
 0xfaa   :  { %v2500_v47 = vadd.f32 %v2584_v58, %v2492_v35 }
 0xfac   :  { %v2501_v22 = vmul.f32 0.5, %v2500_v47 }
 0xfae   :  { %2784 = vtanh.f32 %v2501_v22 }
 0xfb8   :  { %v2785_v23 = vpop.eup %2784 }
 0xfb9   :  { %v2503_v24 = vmul.f32 0.5, %v2785_v23 }
 0xfbb   :  { %v2504_v27 = vadd.f32 0.5, %v2503_v24 }
 0xfbd   :  { %2506 = vst.msk [vmem:[%s3659_s15] sm:$0x3] %vm2505_vm5, %v2504_v27 }
 0xfbe   :  { %2511 = vsyncmov [#allocation4] }
 0xfc1   :  { %s2512_s11 = vpop.sfrf %2511 }
 0xfc2   :  { %p2585_p0 = scmp.ne.s32.totalorder %s2512_s11, 0 }
 0xfc4   :  { %2516 = shalt.err (%p2585_p0)  }
 0xfc5   :  { %2518 = vsyncmov [#allocation4 + $0x1] }
 0xfc8   :  { %s2519_s16 = vpop.sfrf %2518 }
 0xfc9   :  { %p2586_p1 = scmp.ne.s32.totalorder %s2519_s16, 0 }
 0xfcb   :  { %2523 = shalt.err (%p2586_p1)  }

</bundles_post_ra>
